<compile_context>
chip_gen: v7x
topology: tpu7x:2x2x1
jax: 0.10.0
libtpu: 0.0.40
codegen_flags: <defaults>
</compile_context>

<pallas_src>
import jax
import jax.numpy as jnp
import numpy as np
from jax.experimental import pallas as pl
from jax.experimental.pallas import tpu as pltpu

NEG_SLOPE = 0.01          # F.leaky_relu_ default negative_slope
BN_EPS = 1e-5             # nn.BatchNorm2d default eps
MXU_DTYPE = jnp.bfloat16  # MXU operand dtype; accumulation stays f32


# ----------------------------------------------------------------------------
# Banded ("Toeplitz") weights over the UNPADDED width axis.
# ----------------------------------------------------------------------------
def _band_weight(w, W):
    """(KH, KW, CIN, COUT) -> (KH, W*CIN, W*COUT).

    T[kh, wi*CIN+ci, wo*COUT+co] = w[kh, kw, ci, co] where wi == wo + kw - PW
    and 0 <= wi < W; zero elsewhere.  Out-of-range wi (the 'same' zero padding
    columns) are dropped entirely, so no lane-axis pad concat is needed.
    """
    KH, KW, CIN, COUT = w.shape
    PW = KW // 2
    wo = np.arange(W)[:, None, None]
    kw = np.arange(KW)[None, :, None]
    wi = np.arange(W)[None, None, :]
    sel = (wi == wo + kw - PW).astype(np.float32)            # (W, KW, W)
    t = jnp.einsum("okn,hkic->hnioc", sel, w.astype(jnp.float32))
    return t.reshape(KH, W * CIN, W * COUT)


def _pick_tb(B, H, target_rows=256):
    """Largest divisor of B with TB*H <= target_rows: big M per dot while
    keeping grid steps available for pipelining / megacore at larger B."""
    tb = 1
    for cand in range(1, B + 1):
        if B % cand == 0 and cand * H <= target_rows:
            tb = cand
    return tb


# ----------------------------------------------------------------------------
# Kernel 1: bn1 + leaky_relu + conv1, emitting per-tile bn2 partial statistics
# ----------------------------------------------------------------------------
def _make_stage1_kernel(TB, H, W, CIN, COUT, KH):
    M, PH, N = TB * H, KH // 2, W * COUT

    def kernel(x_ref, s_ref, t_ref, w_ref, o_ref, st_ref):
        # bn1 (folded per-channel affine, tiled to W*CIN lanes) + leaky_relu.
        a = x_ref[...] * s_ref[...] + t_ref[...]                 # (M, W*CIN) f32
        a = jnp.where(a >= 0, a, NEG_SLOPE * a).astype(MXU_DTYPE)

        # 'same' H padding: halo-only row concat (W axis needs no pad -- the
        # banded weights already drop the halo columns).
        if PH:
            zr = jnp.zeros((PH, W * CIN), MXU_DTYPE)
            a = jnp.concatenate([zr, a, zr], axis=0)             # (M+2PH, W*CIN)

        # conv1: KH banded matmuls, M = TB*H rows each, f32 accumulation.
        # Batch packing => mask rows whose tap crosses a packed image boundary.
        rows = jax.lax.broadcasted_iota(jnp.int32, (M, 1), 0)
        acc = jnp.zeros((M, N), jnp.float32)
        for kh in range(KH):
            c = jnp.dot(a[kh:kh + M, :], w_ref[kh],
                        preferred_element_type=jnp.float32)
            dh = kh - PH                                          # row offset
            if TB > 1 and dh < 0:
                c = c * (rows % H >= -dh).astype(jnp.float32)
            elif TB > 1 and dh > 0:
                c = c * (rows % H < H - dh).astype(jnp.float32)
            acc = acc + c
        o_ref[...] = acc.astype(o_ref.dtype)                     # lane-dense store

        # bn2 partial stats: lane-dense (2, W*COUT) row sums of the f32 acc;
        # the W-lane-group -> channel fold happens in the wrapper.
        # TODO(synk): use centered per-tile sums at large B*H*W (cancellation).
        st_ref[0] = jnp.concatenate(
            [jnp.sum(acc, axis=0, keepdims=True),
             jnp.sum(acc * acc, axis=0, keepdims=True)], axis=0)

    return kernel


def _stage1(x2d, scale_t, shift_t, t1, TB, H, W, CIN, COUT, KH):
    BH = x2d.shape[0]
    M = TB * H
    NT = BH // M
    kernel = _make_stage1_kernel(TB, H, W, CIN, COUT, KH)
    return pl.pallas_call(
        kernel,
        out_shape=(jax.ShapeDtypeStruct((BH, W * COUT), MXU_DTYPE),
                   jax.ShapeDtypeStruct((NT, 2, W * COUT), jnp.float32)),
        grid=(NT,),
        in_specs=[
            pl.BlockSpec((M, W * CIN), lambda i: (i, 0)),
            pl.BlockSpec((1, W * CIN), lambda i: (0, 0)),
            pl.BlockSpec((1, W * CIN), lambda i: (0, 0)),
            # TODO(synk): pipeline_mode=pl.Buffered(1) for this constant-index
            # weight once tiles grow near v7x's 32 MiB scoped-VMEM default.
            pl.BlockSpec((KH, W * CIN, W * COUT), lambda i: (0, 0, 0)),
        ],
        out_specs=(
            pl.BlockSpec((M, W * COUT), lambda i: (i, 0)),
            pl.BlockSpec((1, 2, W * COUT), lambda i: (i, 0, 0)),
        ),
        compiler_params=pltpu.CompilerParams(dimension_semantics=("parallel",)),
    )(x2d, scale_t, shift_t, t1)


# ----------------------------------------------------------------------------
# Kernel 2: bn2 + leaky_relu + conv2 + fused 1x1 shortcut conv + residual add
# ----------------------------------------------------------------------------
def _make_stage2_kernel(TB, H, W, CIN, COUT, KH, has_shortcut):
    M, PH, N = TB * H, KH // 2, W * COUT

    def kernel(*refs):
        if has_shortcut:
            h_ref, x_ref, s_ref, t_ref, w_ref, wsc_ref, bsc_ref, o_ref = refs
        else:
            h_ref, x_ref, s_ref, t_ref, w_ref, o_ref = refs

        # bn2 + leaky_relu in f32 (no bf16 VALU on v5e); bf16 MXU operands.
        a = h_ref[...].astype(jnp.float32) * s_ref[...] + t_ref[...]   # (M, N)
        a = jnp.where(a >= 0, a, NEG_SLOPE * a).astype(MXU_DTYPE)
        if PH:
            zr = jnp.zeros((PH, N), MXU_DTYPE)
            a = jnp.concatenate([zr, a, zr], axis=0)

        if has_shortcut:
            # Fused 1x1 shortcut conv (block-diagonal weights) + bias.
            acc = jnp.dot(x_ref[...].astype(MXU_DTYPE), wsc_ref[...],
                          preferred_element_type=jnp.float32) + bsc_ref[...]
        else:
            acc = x_ref[...]                                     # identity residual

        rows = jax.lax.broadcasted_iota(jnp.int32, (M, 1), 0)
        for kh in range(KH):
            c = jnp.dot(a[kh:kh + M, :], w_ref[kh],
                        preferred_element_type=jnp.float32)
            dh = kh - PH
            if TB > 1 and dh < 0:
                c = c * (rows % H >= -dh).astype(jnp.float32)
            elif TB > 1 and dh > 0:
                c = c * (rows % H < H - dh).astype(jnp.float32)
            acc = acc + c
        o_ref[...] = acc                                          # lane-dense store

    return kernel


def _stage2(h1, x2d, scale_t, shift_t, t2, tsc, bsc, TB, H, W, CIN, COUT, KH):
    BH = h1.shape[0]
    M = TB * H
    NT = BH // M
    has_sc = tsc is not None
    kernel = _make_stage2_kernel(TB, H, W, CIN, COUT, KH, has_sc)
    in_specs = [
        pl.BlockSpec((M, W * COUT), lambda i: (i, 0)),
        pl.BlockSpec((M, W * CIN), lambda i: (i, 0)),
        pl.BlockSpec((1, W * COUT), lambda i: (0, 0)),
        pl.BlockSpec((1, W * COUT), lambda i: (0, 0)),
        pl.BlockSpec((KH, W * COUT, W * COUT), lambda i: (0, 0, 0)),
    ]
    args = [h1, x2d, scale_t, shift_t, t2]
    if has_sc:
        in_specs += [pl.BlockSpec((W * CIN, W * COUT), lambda i: (0, 0)),
                     pl.BlockSpec((1, W * COUT), lambda i: (0, 0))]
        args += [tsc, bsc]
    return pl.pallas_call(
        kernel,
        out_shape=jax.ShapeDtypeStruct((BH, W * COUT), jnp.float32),
        grid=(NT,),
        in_specs=in_specs,
        out_specs=pl.BlockSpec((M, W * COUT), lambda i: (i, 0)),
        compiler_params=pltpu.CompilerParams(dimension_semantics=("parallel",)),
    )(*args)


# ----------------------------------------------------------------------------
# ConvBlock forward (public API matches the PyTorch module: NCHW in / out)
# ----------------------------------------------------------------------------
def conv_block_forward(x_nchw, params):
    B, CIN, H, W = x_nchw.shape
    w1 = params["w1"]                                  # (KH, KW, CIN, COUT)
    KH, KW, _, COUT = w1.shape
    x = x_nchw.astype(jnp.float32)

    # bn1 training-mode batch statistics (biased variance): one XLA pass,
    # fused with the layout change below.
    mean1 = jnp.mean(x, axis=(0, 2, 3))
    var1 = jnp.var(x, axis=(0, 2, 3))
    scale1 = params["bn1_gamma"] / jnp.sqrt(var1 + BN_EPS)
    shift1 = params["bn1_beta"] - mean1 * scale1

    # Lane-dense flattened layout: rows = B*H (matmul M), lanes = W*C.
    x2d = jnp.transpose(x, (0, 2, 3, 1)).reshape(B * H, W * CIN)

    TB = _pick_tb(B, H)

    t1 = _band_weight(w1, W).astype(MXU_DTYPE)
    h1, st = _stage1(
        x2d,
        jnp.tile(scale1, W).reshape(1, W * CIN).astype(jnp.float32),
        jnp.tile(shift1, W).reshape(1, W * CIN).astype(jnp.float32),
        t1, TB, H, W, CIN, COUT, KH)

    # bn2 stats from the fused per-tile lane sums (no extra pass over h1).
    n = B * H * W
    s = jnp.sum(st, axis=0).reshape(2, W, COUT).sum(axis=1)       # (2, COUT)
    mean2 = s[0] / n
    var2 = jnp.maximum(s[1] / n - mean2 * mean2, 0.0)
    scale2 = params["bn2_gamma"] / jnp.sqrt(var2 + BN_EPS)
    shift2 = params["bn2_beta"] - mean2 * scale2

    t2 = _band_weight(params["w2"], W).astype(MXU_DTYPE)
    if "w_sc" in params:                               # in_channels != out_channels
        # TODO(synk): at realistic W this kron is O(W^2*Cin*Cout); tile W or
        # apply the 1x1 conv per lane-group instead.
        tsc = jnp.kron(jnp.eye(W, dtype=jnp.float32),
                       params["w_sc"].astype(jnp.float32)).astype(MXU_DTYPE)
        bsc = jnp.tile(params["b_sc"], W).reshape(1, W * COUT).astype(jnp.float32)
    else:
        assert CIN == COUT, "identity shortcut requires in_channels == out_channels"
        tsc = bsc = None

    out2d = _stage2(
        h1, x2d,
        jnp.tile(scale2, W).reshape(1, W * COUT).astype(jnp.float32),
        jnp.tile(shift2, W).reshape(1, W * COUT).astype(jnp.float32),
        t2, tsc, bsc, TB, H, W, CIN, COUT, KH)

    out = out2d.reshape(B, H, W, COUT)
    return jnp.transpose(out, (0, 3, 1, 2))            # back to NCHW (API boundary)


# ----------------------------------------------------------------------------
# Pure-JAX f32 reference (mirrors the PyTorch forward) for the correctness check
# ----------------------------------------------------------------------------
def ref_conv_block(x, p):
    def bn(h, gamma, beta):
        mean = jnp.mean(h, axis=(0, 2, 3), keepdims=True)
        var = jnp.var(h, axis=(0, 2, 3), keepdims=True)
        return ((h - mean) / jnp.sqrt(var + BN_EPS)
                * gamma.reshape(1, -1, 1, 1) + beta.reshape(1, -1, 1, 1))

    def lrelu(h):
        return jnp.where(h >= 0, h, NEG_SLOPE * h)

    def conv(h, w, pad):
        return jax.lax.conv_general_dilated(
            h, w, (1, 1), [(pad, pad), (pad, pad)],
            dimension_numbers=("NCHW", "OIHW", "NCHW"),
            precision=jax.lax.Precision.HIGHEST)

    h = conv(lrelu(bn(x, p["bn1_gamma"], p["bn1_beta"])), p["w1_oihw"], 1)
    h = conv(lrelu(bn(h, p["bn2_gamma"], p["bn2_beta"])), p["w2_oihw"], 1)
    sc = conv(x, p["wsc_oihw"], 0) + p["b_sc"].reshape(1, -1, 1, 1)
    return sc + h


if __name__ == "__main__":
    B, CIN, T, F = 2, 4, 16, 16
    COUT = 8
    KH = KW = 3

    key = jax.random.PRNGKey(0)
    ks = jax.random.split(key, 9)
    x = jax.random.normal(ks[0], (B, CIN, T, F), jnp.float32)

    # deterministic synthetic parameters (PyTorch weight layout OIHW)
    w1_oihw = 0.2 * jax.random.normal(ks[1], (COUT, CIN, KH, KW), jnp.float32)
    w2_oihw = 0.2 * jax.random.normal(ks[2], (COUT, COUT, KH, KW), jnp.float32)
    wsc_oihw = 0.2 * jax.random.normal(ks[3], (COUT, CIN, 1, 1), jnp.float32)
    b_sc = 0.1 * jax.random.normal(ks[4], (COUT,), jnp.float32)
    bn1_gamma = 1.0 + 0.1 * jax.random.normal(ks[5], (CIN,), jnp.float32)
    bn1_beta = 0.1 * jax.random.normal(ks[6], (CIN,), jnp.float32)
    bn2_gamma = 1.0 + 0.1 * jax.random.normal(ks[7], (COUT,), jnp.float32)
    bn2_beta = 0.1 * jax.random.normal(ks[8], (COUT,), jnp.float32)

    params = {
        "w1": jnp.transpose(w1_oihw, (2, 3, 1, 0)),   # (KH, KW, CIN, COUT)
        "w2": jnp.transpose(w2_oihw, (2, 3, 1, 0)),   # (KH, KW, COUT, COUT)
        "w_sc": wsc_oihw[:, :, 0, 0].T,               # (CIN, COUT)
        "b_sc": b_sc,
        "bn1_gamma": bn1_gamma, "bn1_beta": bn1_beta,
        "bn2_gamma": bn2_gamma, "bn2_beta": bn2_beta,
    }

    fwd = jax.jit(conv_block_forward)
    out = jax.block_until_ready(fwd(x, params))
    assert out.shape == (B, COUT, T, F)

    ref = ref_conv_block(x, {
        "w1_oihw": w1_oihw, "w2_oihw": w2_oihw, "wsc_oihw": wsc_oihw,
        "b_sc": b_sc, "bn1_gamma": bn1_gamma, "bn1_beta": bn1_beta,
        "bn2_gamma": bn2_gamma, "bn2_beta": bn2_beta,
    })
    # Tolerance loosened vs. the f32 reference: MXU operands are bf16 (f32
    # accumulation) through two chained convs + BN stats, per the perf review.
    np.testing.assert_allclose(np.asarray(out), np.asarray(ref),
                               rtol=5e-2, atol=5e-2)
    print("KERNEL_OK")
</pallas_src>

<mosaic_0001>
module attributes {stable_mosaic.version = 11 : i64} {
  func.func @kernel(%arg0: i32, %arg1: memref<32x64xf32, #tpu.memory_space<vmem>>, %arg2: memref<1x64xf32, #tpu.memory_space<vmem>>, %arg3: memref<1x64xf32, #tpu.memory_space<vmem>>, %arg4: memref<3x64x128xbf16, #tpu.memory_space<vmem>>, %arg5: memref<32x128xbf16, #tpu.memory_space<vmem>>, %arg6: memref<1x2x128xf32, #tpu.memory_space<vmem>>) attributes {dimension_semantics = [#tpu.dimension_semantics<parallel>], iteration_bounds = array<i64: 1>, scalar_prefetch = 0 : i64, scratch_operands = 0 : i64, tpu.core_type = #tpu.core_type<tc>, window_params = [{transform_indices = @transform_0, window_bounds = array<i64: 32, 64>}, {pipeline_mode = #tpu.pipeline_mode<synchronous>, transform_indices = @transform_1, window_bounds = array<i64: 1, 64>}, {pipeline_mode = #tpu.pipeline_mode<synchronous>, transform_indices = @transform_2, window_bounds = array<i64: 1, 64>}, {pipeline_mode = #tpu.pipeline_mode<synchronous>, transform_indices = @transform_3, window_bounds = array<i64: 3, 64, 128>}, {transform_indices = @transform_4, window_bounds = array<i64: 32, 128>}, {transform_indices = @transform_5, window_bounds = array<i64: 1, 2, 128>}]} {
    %c0 = arith.constant 0 : index
    %c0_0 = arith.constant 0 : index
    %0 = vector.load %arg1[%c0, %c0_0] : memref<32x64xf32, #tpu.memory_space<vmem>>, vector<32x64xf32>
    %c0_1 = arith.constant 0 : index
    %c0_2 = arith.constant 0 : index
    %1 = vector.load %arg2[%c0_1, %c0_2] : memref<1x64xf32, #tpu.memory_space<vmem>>, vector<1x64xf32>
    %2 = vector.broadcast %1 : vector<1x64xf32> to vector<32x64xf32>
    %3 = arith.mulf %0, %2 : vector<32x64xf32>
    %c0_3 = arith.constant 0 : index
    %c0_4 = arith.constant 0 : index
    %4 = vector.load %arg3[%c0_3, %c0_4] : memref<1x64xf32, #tpu.memory_space<vmem>>, vector<1x64xf32>
    %5 = vector.broadcast %4 : vector<1x64xf32> to vector<32x64xf32>
    %6 = arith.addf %3, %5 : vector<32x64xf32>
    %cst = arith.constant 0.000000e+00 : f32
    %7 = vector.broadcast %cst : f32 to vector<32x64xf32>
    %8 = arith.cmpf oge, %6, %7 : vector<32x64xf32>
    %cst_5 = arith.constant 0.00999999977 : f32
    %9 = vector.broadcast %cst_5 : f32 to vector<32x64xf32>
    %10 = arith.mulf %9, %6 : vector<32x64xf32>
    %11 = arith.select %8, %6, %10 : vector<32x64xi1>, vector<32x64xf32>
    %12 = arith.truncf %11 : vector<32x64xf32> to vector<32x64xbf16>
    %cst_6 = arith.constant 0.000000e+00 : bf16
    %13 = vector.broadcast %cst_6 : bf16 to vector<1x64xbf16>
    %14 = tpu.concatenate %13, %12, %13 in 0 : vector<1x64xbf16>, vector<32x64xbf16>, vector<1x64xbf16> -> vector<34x64xbf16>
    %15 = tpu.iota {dimensions = array<i32: 0>} : vector<32x1xi32>
    %cst_7 = arith.constant 0.000000e+00 : f32
    %16 = vector.broadcast %cst_7 : f32 to vector<32x128xf32>
    %17 = vector.extract_strided_slice %14 {offsets = [0, 0], sizes = [32, 64], strides = [1, 1]} : vector<34x64xbf16> to vector<32x64xbf16>
    %c0_8 = arith.constant 0 : index
    %c0_9 = arith.constant 0 : index
    %c0_10 = arith.constant 0 : index
    %18 = vector.load %arg4[%c0_8, %c0_9, %c0_10] : memref<3x64x128xbf16, #tpu.memory_space<vmem>>, vector<1x64x128xbf16>
    %19 = vector.shape_cast %18 : vector<1x64x128xbf16> to vector<64x128xbf16>
    %cst_11 = arith.constant dense<0.000000e+00> : vector<32x128xf32>
    %20 = tpu.matmul %17, %19, %cst_11 {dimension_numbers = #tpu.dot_dimension_numbers<[1], [0], [0], [1], [0, 0, 1, 1], [], []>} : vector<32x64xbf16>, vector<64x128xbf16>, vector<32x128xf32> -> vector<32x128xf32>
    %c16_i32 = arith.constant 16 : i32
    %c0_i32 = arith.constant 0 : i32
    %21 = arith.cmpi eq, %c16_i32, %c0_i32 : i32
    %c1_i32 = arith.constant 1 : i32
    %22 = arith.select %21, %c1_i32, %c16_i32 : i32
    %23 = vector.broadcast %22 : i32 to vector<32x1xi32>
    %24 = arith.remsi %15, %23 : vector<32x1xi32>
    %c0_i32_12 = arith.constant 0 : i32
    %25 = vector.broadcast %c0_i32_12 : i32 to vector<32x1xi32>
    %26 = arith.cmpi ne, %24, %25 : vector<32x1xi32>
    %c0_i32_13 = arith.constant 0 : i32
    %27 = vector.broadcast %c0_i32_13 : i32 to vector<32x1xi32>
    %28 = arith.cmpi slt, %24, %27 : vector<32x1xi32>
    %c0_i32_14 = arith.constant 0 : i32
    %29 = arith.cmpi slt, %22, %c0_i32_14 : i32
    %30 = vector.broadcast %29 : i1 to vector<32x1xi1>
    %31 = vector.broadcast %30 : vector<32x1xi1> to vector<32x1xi1>
    %32 = arith.xori %28, %31 : vector<32x1xi1>
    %33 = arith.andi %32, %26 : vector<32x1xi1>
    %34 = vector.broadcast %22 : i32 to vector<32x1xi32>
    %35 = arith.addi %24, %34 : vector<32x1xi32>
    %36 = arith.select %33, %35, %24 : vector<32x1xi1>, vector<32x1xi32>
    %c1_i32_15 = arith.constant 1 : i32
    %37 = vector.broadcast %c1_i32_15 : i32 to vector<32x1xi32>
    %38 = arith.cmpi sge, %36, %37 : vector<32x1xi32>
    %39 = arith.extui %38 : vector<32x1xi1> to vector<32x1xi32>
    %40 = arith.sitofp %39 : vector<32x1xi32> to vector<32x1xf32>
    %41 = vector.broadcast %40 : vector<32x1xf32> to vector<32x128xf32>
    %42 = arith.mulf %20, %41 : vector<32x128xf32>
    %43 = arith.addf %16, %42 : vector<32x128xf32>
    %44 = vector.extract_strided_slice %14 {offsets = [1, 0], sizes = [32, 64], strides = [1, 1]} : vector<34x64xbf16> to vector<32x64xbf16>
    %c1 = arith.constant 1 : index
    %c0_16 = arith.constant 0 : index
    %c0_17 = arith.constant 0 : index
    %45 = vector.load %arg4[%c1, %c0_16, %c0_17] : memref<3x64x128xbf16, #tpu.memory_space<vmem>>, vector<1x64x128xbf16>
    %46 = vector.shape_cast %45 : vector<1x64x128xbf16> to vector<64x128xbf16>
    %cst_18 = arith.constant dense<0.000000e+00> : vector<32x128xf32>
    %47 = tpu.matmul %44, %46, %cst_18 {dimension_numbers = #tpu.dot_dimension_numbers<[1], [0], [0], [1], [0, 0, 1, 1], [], []>} : vector<32x64xbf16>, vector<64x128xbf16>, vector<32x128xf32> -> vector<32x128xf32>
    %48 = arith.addf %43, %47 : vector<32x128xf32>
    %49 = vector.extract_strided_slice %14 {offsets = [2, 0], sizes = [32, 64], strides = [1, 1]} : vector<34x64xbf16> to vector<32x64xbf16>
    %c2 = arith.constant 2 : index
    %c0_19 = arith.constant 0 : index
    %c0_20 = arith.constant 0 : index
    %50 = vector.load %arg4[%c2, %c0_19, %c0_20] : memref<3x64x128xbf16, #tpu.memory_space<vmem>>, vector<1x64x128xbf16>
    %51 = vector.shape_cast %50 : vector<1x64x128xbf16> to vector<64x128xbf16>
    %cst_21 = arith.constant dense<0.000000e+00> : vector<32x128xf32>
    %52 = tpu.matmul %49, %51, %cst_21 {dimension_numbers = #tpu.dot_dimension_numbers<[1], [0], [0], [1], [0, 0, 1, 1], [], []>} : vector<32x64xbf16>, vector<64x128xbf16>, vector<32x128xf32> -> vector<32x128xf32>
    %c16_i32_22 = arith.constant 16 : i32
    %c0_i32_23 = arith.constant 0 : i32
    %53 = arith.cmpi eq, %c16_i32_22, %c0_i32_23 : i32
    %c1_i32_24 = arith.constant 1 : i32
    %54 = arith.select %53, %c1_i32_24, %c16_i32_22 : i32
    %55 = vector.broadcast %54 : i32 to vector<32x1xi32>
    %56 = arith.remsi %15, %55 : vector<32x1xi32>
    %c0_i32_25 = arith.constant 0 : i32
    %57 = vector.broadcast %c0_i32_25 : i32 to vector<32x1xi32>
    %58 = arith.cmpi ne, %56, %57 : vector<32x1xi32>
    %c0_i32_26 = arith.constant 0 : i32
    %59 = vector.broadcast %c0_i32_26 : i32 to vector<32x1xi32>
    %60 = arith.cmpi slt, %56, %59 : vector<32x1xi32>
    %c0_i32_27 = arith.constant 0 : i32
    %61 = arith.cmpi slt, %54, %c0_i32_27 : i32
    %62 = vector.broadcast %61 : i1 to vector<32x1xi1>
    %63 = vector.broadcast %62 : vector<32x1xi1> to vector<32x1xi1>
    %64 = arith.xori %60, %63 : vector<32x1xi1>
    %65 = arith.andi %64, %58 : vector<32x1xi1>
    %66 = vector.broadcast %54 : i32 to vector<32x1xi32>
    %67 = arith.addi %56, %66 : vector<32x1xi32>
    %68 = arith.select %65, %67, %56 : vector<32x1xi1>, vector<32x1xi32>
    %c15_i32 = arith.constant 15 : i32
    %69 = vector.broadcast %c15_i32 : i32 to vector<32x1xi32>
    %70 = arith.cmpi slt, %68, %69 : vector<32x1xi32>
    %71 = arith.extui %70 : vector<32x1xi1> to vector<32x1xi32>
    %72 = arith.sitofp %71 : vector<32x1xi32> to vector<32x1xf32>
    %73 = vector.broadcast %72 : vector<32x1xf32> to vector<32x128xf32>
    %74 = arith.mulf %52, %73 : vector<32x128xf32>
    %75 = arith.addf %48, %74 : vector<32x128xf32>
    %76 = arith.truncf %75 : vector<32x128xf32> to vector<32x128xbf16>
    %c0_28 = arith.constant 0 : index
    %c0_29 = arith.constant 0 : index
    %77 = vector.load %arg5[%c0_28, %c0_29] : memref<32x128xbf16, #tpu.memory_space<vmem>>, vector<32x128xbf16>
    tpu.vector_store %arg5[%c0_28, %c0_29], %76 {strides = array<i32>} : memref<32x128xbf16, #tpu.memory_space<vmem>>, vector<32x128xbf16>,
    %cst_30 = arith.constant dense<0.000000e+00> : vector<128xf32>
    %78 = vector.multi_reduction <add>, %75, %cst_30 [0] : vector<32x128xf32> to vector<128xf32>
    %79 = vector.shape_cast %78 : vector<128xf32> to vector<1x128xf32>
    %80 = arith.mulf %75, %75 : vector<32x128xf32>
    %cst_31 = arith.constant dense<0.000000e+00> : vector<128xf32>
    %81 = vector.multi_reduction <add>, %80, %cst_31 [0] : vector<32x128xf32> to vector<128xf32>
    %82 = vector.shape_cast %81 : vector<128xf32> to vector<1x128xf32>
    %83 = tpu.concatenate %79, %82 in 0 : vector<1x128xf32>, vector<1x128xf32> -> vector<2x128xf32>
    %c0_32 = arith.constant 0 : index
    %c0_33 = arith.constant 0 : index
    %c0_34 = arith.constant 0 : index
    %84 = vector.load %arg6[%c0_32, %c0_33, %c0_34] : memref<1x2x128xf32, #tpu.memory_space<vmem>>, vector<1x2x128xf32>
    %85 = vector.shape_cast %84 : vector<1x2x128xf32> to vector<2x128xf32>
    %86 = vector.shape_cast %83 : vector<2x128xf32> to vector<1x2x128xf32>
    tpu.vector_store %arg6[%c0_32, %c0_33, %c0_34], %86 {strides = array<i32>} : memref<1x2x128xf32, #tpu.memory_space<vmem>>, vector<1x2x128xf32>,
    return
  }
  func.func @transform_0(%arg0: i32) -> (i32, i32) {
    %c0_i32 = arith.constant 0 : i32
    %c0_i32_0 = arith.constant 0 : i32
    return %arg0, %c0_i32 : i32, i32
  }
  func.func @transform_1(%arg0: i32) -> (i32, i32) {
    %c0_i32 = arith.constant 0 : i32
    %c0_i32_0 = arith.constant 0 : i32
    %c0_i32_1 = arith.constant 0 : i32
    return %c0_i32, %c0_i32_0 : i32, i32
  }
  func.func @transform_2(%arg0: i32) -> (i32, i32) {
    %c0_i32 = arith.constant 0 : i32
    %c0_i32_0 = arith.constant 0 : i32
    %c0_i32_1 = arith.constant 0 : i32
    return %c0_i32, %c0_i32_0 : i32, i32
  }
  func.func @transform_3(%arg0: i32) -> (i32, i32, i32) {
    %c0_i32 = arith.constant 0 : i32
    %c0_i32_0 = arith.constant 0 : i32
    %c0_i32_1 = arith.constant 0 : i32
    %c0_i32_2 = arith.constant 0 : i32
    return %c0_i32, %c0_i32_0, %c0_i32_1 : i32, i32, i32
  }
  func.func @transform_4(%arg0: i32) -> (i32, i32) {
    %c0_i32 = arith.constant 0 : i32
    %c0_i32_0 = arith.constant 0 : i32
    return %arg0, %c0_i32 : i32, i32
  }
  func.func @transform_5(%arg0: i32) -> (i32, i32, i32) {
    %c0_i32 = arith.constant 0 : i32
    %c0_i32_0 = arith.constant 0 : i32
    %c0_i32_1 = arith.constant 0 : i32
    return %arg0, %c0_i32, %c0_i32_0 : i32, i32, i32
  }
}

module attributes {stable_mosaic.version = 11 : i64} {
  func.func @kernel(%arg0: i32, %arg1: memref<32x128xbf16, #tpu.memory_space<vmem>>, %arg2: memref<32x64xf32, #tpu.memory_space<vmem>>, %arg3: memref<1x128xf32, #tpu.memory_space<vmem>>, %arg4: memref<1x128xf32, #tpu.memory_space<vmem>>, %arg5: memref<3x128x128xbf16, #tpu.memory_space<vmem>>, %arg6: memref<64x128xbf16, #tpu.memory_space<vmem>>, %arg7: memref<1x128xf32, #tpu.memory_space<vmem>>, %arg8: memref<32x128xf32, #tpu.memory_space<vmem>>) attributes {dimension_semantics = [#tpu.dimension_semantics<parallel>], iteration_bounds = array<i64: 1>, scalar_prefetch = 0 : i64, scratch_operands = 0 : i64, tpu.core_type = #tpu.core_type<tc>, window_params = [{transform_indices = @transform_0, window_bounds = array<i64: 32, 128>}, {transform_indices = @transform_1, window_bounds = array<i64: 32, 64>}, {pipeline_mode = #tpu.pipeline_mode<synchronous>, transform_indices = @transform_2, window_bounds = array<i64: 1, 128>}, {pipeline_mode = #tpu.pipeline_mode<synchronous>, transform_indices = @transform_3, window_bounds = array<i64: 1, 128>}, {pipeline_mode = #tpu.pipeline_mode<synchronous>, transform_indices = @transform_4, window_bounds = array<i64: 3, 128, 128>}, {pipeline_mode = #tpu.pipeline_mode<synchronous>, transform_indices = @transform_5, window_bounds = array<i64: 64, 128>}, {pipeline_mode = #tpu.pipeline_mode<synchronous>, transform_indices = @transform_6, window_bounds = array<i64: 1, 128>}, {transform_indices = @transform_7, window_bounds = array<i64: 32, 128>}]} {
    %c0 = arith.constant 0 : index
    %c0_0 = arith.constant 0 : index
    %0 = vector.load %arg1[%c0, %c0_0] : memref<32x128xbf16, #tpu.memory_space<vmem>>, vector<32x128xbf16>
    %1 = arith.extf %0 : vector<32x128xbf16> to vector<32x128xf32>
    %c0_1 = arith.constant 0 : index
    %c0_2 = arith.constant 0 : index
    %2 = vector.load %arg3[%c0_1, %c0_2] : memref<1x128xf32, #tpu.memory_space<vmem>>, vector<1x128xf32>
    %3 = vector.broadcast %2 : vector<1x128xf32> to vector<32x128xf32>
    %4 = arith.mulf %1, %3 : vector<32x128xf32>
    %c0_3 = arith.constant 0 : index
    %c0_4 = arith.constant 0 : index
    %5 = vector.load %arg4[%c0_3, %c0_4] : memref<1x128xf32, #tpu.memory_space<vmem>>, vector<1x128xf32>
    %6 = vector.broadcast %5 : vector<1x128xf32> to vector<32x128xf32>
    %7 = arith.addf %4, %6 : vector<32x128xf32>
    %cst = arith.constant 0.000000e+00 : f32
    %8 = vector.broadcast %cst : f32 to vector<32x128xf32>
    %9 = arith.cmpf oge, %7, %8 : vector<32x128xf32>
    %cst_5 = arith.constant 0.00999999977 : f32
    %10 = vector.broadcast %cst_5 : f32 to vector<32x128xf32>
    %11 = arith.mulf %10, %7 : vector<32x128xf32>
    %12 = arith.select %9, %7, %11 : vector<32x128xi1>, vector<32x128xf32>
    %13 = arith.truncf %12 : vector<32x128xf32> to vector<32x128xbf16>
    %cst_6 = arith.constant 0.000000e+00 : bf16
    %14 = vector.broadcast %cst_6 : bf16 to vector<1x128xbf16>
    %15 = tpu.concatenate %14, %13, %14 in 0 : vector<1x128xbf16>, vector<32x128xbf16>, vector<1x128xbf16> -> vector<34x128xbf16>
    %c0_7 = arith.constant 0 : index
    %c0_8 = arith.constant 0 : index
    %16 = vector.load %arg2[%c0_7, %c0_8] : memref<32x64xf32, #tpu.memory_space<vmem>>, vector<32x64xf32>
    %17 = arith.truncf %16 : vector<32x64xf32> to vector<32x64xbf16>
    %c0_9 = arith.constant 0 : index
    %c0_10 = arith.constant 0 : index
    %18 = vector.load %arg6[%c0_9, %c0_10] : memref<64x128xbf16, #tpu.memory_space<vmem>>, vector<64x128xbf16>
    %cst_11 = arith.constant dense<0.000000e+00> : vector<32x128xf32>
    %19 = tpu.matmul %17, %18, %cst_11 {dimension_numbers = #tpu.dot_dimension_numbers<[1], [0], [0], [1], [0, 0, 1, 1], [], []>} : vector<32x64xbf16>, vector<64x128xbf16>, vector<32x128xf32> -> vector<32x128xf32>
    %c0_12 = arith.constant 0 : index
    %c0_13 = arith.constant 0 : index
    %20 = vector.load %arg7[%c0_12, %c0_13] : memref<1x128xf32, #tpu.memory_space<vmem>>, vector<1x128xf32>
    %21 = vector.broadcast %20 : vector<1x128xf32> to vector<32x128xf32>
    %22 = arith.addf %19, %21 : vector<32x128xf32>
    %23 = tpu.iota {dimensions = array<i32: 0>} : vector<32x1xi32>
    %24 = vector.extract_strided_slice %15 {offsets = [0, 0], sizes = [32, 128], strides = [1, 1]} : vector<34x128xbf16> to vector<32x128xbf16>
    %c0_14 = arith.constant 0 : index
    %c0_15 = arith.constant 0 : index
    %c0_16 = arith.constant 0 : index
    %25 = vector.load %arg5[%c0_14, %c0_15, %c0_16] : memref<3x128x128xbf16, #tpu.memory_space<vmem>>, vector<1x128x128xbf16>
    %26 = vector.shape_cast %25 : vector<1x128x128xbf16> to vector<128x128xbf16>
    %cst_17 = arith.constant dense<0.000000e+00> : vector<32x128xf32>
    %27 = tpu.matmul %24, %26, %cst_17 {dimension_numbers = #tpu.dot_dimension_numbers<[1], [0], [0], [1], [0, 0, 1, 1], [], []>} : vector<32x128xbf16>, vector<128x128xbf16>, vector<32x128xf32> -> vector<32x128xf32>
    %c16_i32 = arith.constant 16 : i32
    %c0_i32 = arith.constant 0 : i32
    %28 = arith.cmpi eq, %c16_i32, %c0_i32 : i32
    %c1_i32 = arith.constant 1 : i32
    %29 = arith.select %28, %c1_i32, %c16_i32 : i32
    %30 = vector.broadcast %29 : i32 to vector<32x1xi32>
    %31 = arith.remsi %23, %30 : vector<32x1xi32>
    %c0_i32_18 = arith.constant 0 : i32
    %32 = vector.broadcast %c0_i32_18 : i32 to vector<32x1xi32>
    %33 = arith.cmpi ne, %31, %32 : vector<32x1xi32>
    %c0_i32_19 = arith.constant 0 : i32
    %34 = vector.broadcast %c0_i32_19 : i32 to vector<32x1xi32>
    %35 = arith.cmpi slt, %31, %34 : vector<32x1xi32>
    %c0_i32_20 = arith.constant 0 : i32
    %36 = arith.cmpi slt, %29, %c0_i32_20 : i32
    %37 = vector.broadcast %36 : i1 to vector<32x1xi1>
    %38 = vector.broadcast %37 : vector<32x1xi1> to vector<32x1xi1>
    %39 = arith.xori %35, %38 : vector<32x1xi1>
    %40 = arith.andi %39, %33 : vector<32x1xi1>
    %41 = vector.broadcast %29 : i32 to vector<32x1xi32>
    %42 = arith.addi %31, %41 : vector<32x1xi32>
    %43 = arith.select %40, %42, %31 : vector<32x1xi1>, vector<32x1xi32>
    %c1_i32_21 = arith.constant 1 : i32
    %44 = vector.broadcast %c1_i32_21 : i32 to vector<32x1xi32>
    %45 = arith.cmpi sge, %43, %44 : vector<32x1xi32>
    %46 = arith.extui %45 : vector<32x1xi1> to vector<32x1xi32>
    %47 = arith.sitofp %46 : vector<32x1xi32> to vector<32x1xf32>
    %48 = vector.broadcast %47 : vector<32x1xf32> to vector<32x128xf32>
    %49 = arith.mulf %27, %48 : vector<32x128xf32>
    %50 = arith.addf %22, %49 : vector<32x128xf32>
    %51 = vector.extract_strided_slice %15 {offsets = [1, 0], sizes = [32, 128], strides = [1, 1]} : vector<34x128xbf16> to vector<32x128xbf16>
    %c1 = arith.constant 1 : index
    %c0_22 = arith.constant 0 : index
    %c0_23 = arith.constant 0 : index
    %52 = vector.load %arg5[%c1, %c0_22, %c0_23] : memref<3x128x128xbf16, #tpu.memory_space<vmem>>, vector<1x128x128xbf16>
    %53 = vector.shape_cast %52 : vector<1x128x128xbf16> to vector<128x128xbf16>
    %cst_24 = arith.constant dense<0.000000e+00> : vector<32x128xf32>
    %54 = tpu.matmul %51, %53, %cst_24 {dimension_numbers = #tpu.dot_dimension_numbers<[1], [0], [0], [1], [0, 0, 1, 1], [], []>} : vector<32x128xbf16>, vector<128x128xbf16>, vector<32x128xf32> -> vector<32x128xf32>
    %55 = arith.addf %50, %54 : vector<32x128xf32>
    %56 = vector.extract_strided_slice %15 {offsets = [2, 0], sizes = [32, 128], strides = [1, 1]} : vector<34x128xbf16> to vector<32x128xbf16>
    %c2 = arith.constant 2 : index
    %c0_25 = arith.constant 0 : index
    %c0_26 = arith.constant 0 : index
    %57 = vector.load %arg5[%c2, %c0_25, %c0_26] : memref<3x128x128xbf16, #tpu.memory_space<vmem>>, vector<1x128x128xbf16>
    %58 = vector.shape_cast %57 : vector<1x128x128xbf16> to vector<128x128xbf16>
    %cst_27 = arith.constant dense<0.000000e+00> : vector<32x128xf32>
    %59 = tpu.matmul %56, %58, %cst_27 {dimension_numbers = #tpu.dot_dimension_numbers<[1], [0], [0], [1], [0, 0, 1, 1], [], []>} : vector<32x128xbf16>, vector<128x128xbf16>, vector<32x128xf32> -> vector<32x128xf32>
    %c16_i32_28 = arith.constant 16 : i32
    %c0_i32_29 = arith.constant 0 : i32
    %60 = arith.cmpi eq, %c16_i32_28, %c0_i32_29 : i32
    %c1_i32_30 = arith.constant 1 : i32
    %61 = arith.select %60, %c1_i32_30, %c16_i32_28 : i32
    %62 = vector.broadcast %61 : i32 to vector<32x1xi32>
    %63 = arith.remsi %23, %62 : vector<32x1xi32>
    %c0_i32_31 = arith.constant 0 : i32
    %64 = vector.broadcast %c0_i32_31 : i32 to vector<32x1xi32>
    %65 = arith.cmpi ne, %63, %64 : vector<32x1xi32>
    %c0_i32_32 = arith.constant 0 : i32
    %66 = vector.broadcast %c0_i32_32 : i32 to vector<32x1xi32>
    %67 = arith.cmpi slt, %63, %66 : vector<32x1xi32>
    %c0_i32_33 = arith.constant 0 : i32
    %68 = arith.cmpi slt, %61, %c0_i32_33 : i32
    %69 = vector.broadcast %68 : i1 to vector<32x1xi1>
    %70 = vector.broadcast %69 : vector<32x1xi1> to vector<32x1xi1>
    %71 = arith.xori %67, %70 : vector<32x1xi1>
    %72 = arith.andi %71, %65 : vector<32x1xi1>
    %73 = vector.broadcast %61 : i32 to vector<32x1xi32>
    %74 = arith.addi %63, %73 : vector<32x1xi32>
    %75 = arith.select %72, %74, %63 : vector<32x1xi1>, vector<32x1xi32>
    %c15_i32 = arith.constant 15 : i32
    %76 = vector.broadcast %c15_i32 : i32 to vector<32x1xi32>
    %77 = arith.cmpi slt, %75, %76 : vector<32x1xi32>
    %78 = arith.extui %77 : vector<32x1xi1> to vector<32x1xi32>
    %79 = arith.sitofp %78 : vector<32x1xi32> to vector<32x1xf32>
    %80 = vector.broadcast %79 : vector<32x1xf32> to vector<32x128xf32>
    %81 = arith.mulf %59, %80 : vector<32x128xf32>
    %82 = arith.addf %55, %81 : vector<32x128xf32>
    %c0_34 = arith.constant 0 : index
    %c0_35 = arith.constant 0 : index
    %83 = vector.load %arg8[%c0_34, %c0_35] : memref<32x128xf32, #tpu.memory_space<vmem>>, vector<32x128xf32>
    tpu.vector_store %arg8[%c0_34, %c0_35], %82 {strides = array<i32>} : memref<32x128xf32, #tpu.memory_space<vmem>>, vector<32x128xf32>,
    return
  }
  func.func @transform_0(%arg0: i32) -> (i32, i32) {
    %c0_i32 = arith.constant 0 : i32
    %c0_i32_0 = arith.constant 0 : i32
    return %arg0, %c0_i32 : i32, i32
  }
  func.func @transform_1(%arg0: i32) -> (i32, i32) {
    %c0_i32 = arith.constant 0 : i32
    %c0_i32_0 = arith.constant 0 : i32
    return %arg0, %c0_i32 : i32, i32
  }
  func.func @transform_2(%arg0: i32) -> (i32, i32) {
    %c0_i32 = arith.constant 0 : i32
    %c0_i32_0 = arith.constant 0 : i32
    %c0_i32_1 = arith.constant 0 : i32
    return %c0_i32, %c0_i32_0 : i32, i32
  }
  func.func @transform_3(%arg0: i32) -> (i32, i32) {
    %c0_i32 = arith.constant 0 : i32
    %c0_i32_0 = arith.constant 0 : i32
    %c0_i32_1 = arith.constant 0 : i32
    return %c0_i32, %c0_i32_0 : i32, i32
  }
  func.func @transform_4(%arg0: i32) -> (i32, i32, i32) {
    %c0_i32 = arith.constant 0 : i32
    %c0_i32_0 = arith.constant 0 : i32
    %c0_i32_1 = arith.constant 0 : i32
    %c0_i32_2 = arith.constant 0 : i32
    return %c0_i32, %c0_i32_0, %c0_i32_1 : i32, i32, i32
  }
  func.func @transform_5(%arg0: i32) -> (i32, i32) {
    %c0_i32 = arith.constant 0 : i32
    %c0_i32_0 = arith.constant 0 : i32
    %c0_i32_1 = arith.constant 0 : i32
    return %c0_i32, %c0_i32_0 : i32, i32
  }
  func.func @transform_6(%arg0: i32) -> (i32, i32) {
    %c0_i32 = arith.constant 0 : i32
    %c0_i32_0 = arith.constant 0 : i32
    %c0_i32_1 = arith.constant 0 : i32
    return %c0_i32, %c0_i32_0 : i32, i32
  }
  func.func @transform_7(%arg0: i32) -> (i32, i32) {
    %c0_i32 = arith.constant 0 : i32
    %c0_i32_0 = arith.constant 0 : i32
    return %arg0, %c0_i32 : i32, i32
  }
}

</mosaic_0001>

<bundles_post_ra>
// kernel: tile.28
= control target key start
LH: loop header
LB: loop body
LE: loop exit
PB: predicated region body
PF: predicated region fallthrough
CT: control target
= control target key end

     0   :  { %s28_s0 = inlined_call_operand.vmem [shape: f32[4], index: 0, kind: input, shape index: {}]   ;;  %s29_s1 = inlined_call_operand.vmem [shape: f32[16,4], index: 1, kind: output, shape index: {}]  }
   0x1   :  { %v4_v0 = vld [vmem:[%s28_s0] ss:$0 sm:$0xff] }
   0x2   :  { %5 = vst [vmem:[%s29_s1] sm:$0xff] %v4_v0  ;;  %8 = vst [vmem:[%s29_s1 + $0x8] sm:$0xff] %v4_v0 }

// kernel: tile.29
= control target key start
LH: loop header
LB: loop body
LE: loop exit
PB: predicated region body
PF: predicated region fallthrough
CT: control target
= control target key end

     0   :  { %s131_s10 = smov 60   ;;  %s132_s11 = smov 52   ;;  %vm3_vm0 = vcmask 31744   ;;  %vm9_vm1 = vcmask 523744   ;;  %vm15_vm2 = vcmask 490944   ;;  %vm21_vm3 = vcmask 458144   ;;  %s207_s0 = inlined_call_operand.vmem [shape: f32[16,4], index: 0, kind: input, shape index: {}]   ;;  %s208_s1 = inlined_call_operand.vmem [shape: f32[1,64], index: 1, kind: output, shape index: {}]  }
   0x1   :  { %v101_v0 = vld [vmem:[%s207_s0 + $0xf] sm:$0x1]   ;;  %v103_v1 = vld [vmem:[%s207_s0 + $0xd] sm:$0x1]   ;;  %v102_v2 = vld [vmem:[%s207_s0 + $0xe] sm:$0x1]  }
   0x2   :  { %7 = vrot.lane.b32.xlu0 %v101_v0, %s131_s10  ;;  %19 = vrot.lane.b32.xlu1 %v103_v1, %s132_s11  ;;  %v104_v3 = vld [vmem:[%s207_s0 + $0xc] sm:$0x1]   ;;  %s133_s16 = smov 56   ;;  %s134_s17 = smov 48   ;;  %v105_v4 = vld [vmem:[%s207_s0 + $0xb] sm:$0x1]  }
   0x3   :  { %v106_v5 = vld [vmem:[%s207_s0 + $0xa] sm:$0x1]   ;;  %v2_v6 = vld [vmem:[%s207_s0] sm:$0x1]   ;;  %s135_s24 = smov 44   ;;  %s136_s25 = smov 40  }
   0x4   :  { %4 = vst.msk [vmem:[#allocation0] sm:$0x1] %vm3_vm0, %v2_v6   ;;  %v107_v7 = vld [vmem:[%s207_s0 + $0x9] sm:$0x1]   ;;  %v108_v8 = vld [vmem:[%s207_s0 + $0x8] sm:$0x1]  }
   0x5   :  { %s137_s30 = smov 36   ;;  %s138_s2 = smov 32   ;;  %v109_v9 = vld [vmem:[%s207_s0 + $0x7] sm:$0x1]   ;;  %v110_v10 = vld [vmem:[%s207_s0 + $0x6] sm:$0x1]  }
   0x6   :  { %13 = vrot.lane.b32.xlu0 %v102_v2, %s133_s16  ;;  %25 = vrot.lane.b32.xlu1 %v104_v3, %s134_s17  ;;  %s139_s7 = smov 28   ;;  %s140_s8 = smov 24   ;;  %v111_v11 = vld [vmem:[%s207_s0 + $0x5] sm:$0x1]   ;;  %v112_v12 = vld [vmem:[%s207_s0 + $0x4] sm:$0x1]  }
   0x7   :  { %s141_s13 = smov 20   ;;  %s142_s14 = smov 16   ;;  %v113_v13 = vld [vmem:[%s207_s0 + $0x3] sm:$0x1]   ;;  %v114_v14 = vld [vmem:[%s207_s0 + $0x2] sm:$0x1]  }
   0x8   :  { %s143_s19 = smov 12   ;;  %s144_s20 = smov 8   ;;  %v115_v15 = vld [vmem:[%s207_s0 + $0x1] sm:$0x1]   ;;  %vm27_vm4 = vcmask 425344   ;;  %vm33_vm5 = vcmask 392544  }
   0x9   :  { %s145_s0 = smov 4   ;;  %vm39_vm6 = vcmask 359744   ;;  %vm45_vm7 = vcmask 326944   ;;  %vm51_vm8 = vcmask 294144   ;;  %vm57_vm9 = vcmask 261344  }
   0xa   :  { %31 = vrot.lane.b32.xlu0 %v105_v4, %s135_s24  ;;  %37 = vrot.lane.b32.xlu1 %v106_v5, %s136_s25  ;;  %vm63_vm10 = vcmask 228544   ;;  %vm69_vm11 = vcmask 195744   ;;  %vm75_vm12 = vcmask 162944   ;;  %vm81_vm13 = vcmask 130144  }
   0xb   :  { %vm87_vm14 = vcmask 97344   ;;  %vm93_vm15 = vcmask 64544  }
   0xe   :  { %43 = vrot.lane.b32.xlu0 %v107_v7, %s137_s30  ;;  %49 = vrot.lane.b32.xlu1 %v108_v8, %s138_s2 }
  0x12   :  { %55 = vrot.lane.b32.xlu0 %v109_v9, %s139_s7  ;;  %61 = vrot.lane.b32.xlu1 %v110_v10, %s140_s8 }
  0x16   :  { %67 = vrot.lane.b32.xlu0 %v111_v11, %s141_s13  ;;  %73 = vrot.lane.b32.xlu1 %v112_v12, %s142_s14 }
  0x1a   :  { %79 = vrot.lane.b32.xlu0 %v113_v13, %s143_s19  ;;  %85 = vrot.lane.b32.xlu1 %v114_v14, %s144_s20 }
  0x1e   :  { %91 = vrot.lane.b32.xlu0 %v115_v15, %s145_s0 }
  0x74   :  { %v8_v16 = vpop.permute.xlu0 %7   ;;  %v20_v17 = vpop.permute.xlu1 %19  }
  0x75   :  { %10 = vst.msk [vmem:[#allocation0] sm:$0x1] %vm9_vm1, %v8_v16  }
  0x78   :  { %v14_v18 = vpop.permute.xlu0 %13   ;;  %v26_v19 = vpop.permute.xlu1 %25  }
  0x79   :  { %16 = vst.msk [vmem:[#allocation0] sm:$0x1] %vm15_vm2, %v14_v18  }
  0x7a   :  { %22 = vst.msk [vmem:[#allocation0] sm:$0x1] %vm21_vm3, %v20_v17  }
  0x7b   :  { %28 = vst.msk [vmem:[#allocation0] sm:$0x1] %vm27_vm4, %v26_v19  }
  0x7c   :  { %v32_v20 = vpop.permute.xlu0 %31   ;;  %v38_v21 = vpop.permute.xlu1 %37  }
  0x7d   :  { %34 = vst.msk [vmem:[#allocation0] sm:$0x1] %vm33_vm5, %v32_v20  }
  0x7e   :  { %40 = vst.msk [vmem:[#allocation0] sm:$0x1] %vm39_vm6, %v38_v21  }
  0x80   :  { %v44_v22 = vpop.permute.xlu0 %43   ;;  %v50_v23 = vpop.permute.xlu1 %49  }
  0x81   :  { %46 = vst.msk [vmem:[#allocation0] sm:$0x1] %vm45_vm7, %v44_v22  }
  0x82   :  { %52 = vst.msk [vmem:[#allocation0] sm:$0x1] %vm51_vm8, %v50_v23  }
  0x84   :  { %v56_v24 = vpop.permute.xlu0 %55   ;;  %v62_v25 = vpop.permute.xlu1 %61  }
  0x85   :  { %58 = vst.msk [vmem:[#allocation0] sm:$0x1] %vm57_vm9, %v56_v24  }
  0x86   :  { %64 = vst.msk [vmem:[#allocation0] sm:$0x1] %vm63_vm10, %v62_v25  }
  0x88   :  { %v68_v26 = vpop.permute.xlu0 %67   ;;  %v74_v27 = vpop.permute.xlu1 %73  }
  0x89   :  { %70 = vst.msk [vmem:[#allocation0] sm:$0x1] %vm69_vm11, %v68_v26  }
  0x8a   :  { %76 = vst.msk [vmem:[#allocation0] sm:$0x1] %vm75_vm12, %v74_v27  }
  0x8c   :  { %v80_v28 = vpop.permute.xlu0 %79   ;;  %v86_v29 = vpop.permute.xlu1 %85  }
  0x8d   :  { %82 = vst.msk [vmem:[#allocation0] sm:$0x1] %vm81_vm13, %v80_v28  }
  0x8e   :  { %88 = vst.msk [vmem:[#allocation0] sm:$0x1] %vm87_vm14, %v86_v29  }
  0x90   :  { %v92_v30 = vpop.permute.xlu0 %91  }
  0x91   :  { %94 = vst.msk [vmem:[#allocation0] sm:$0x1] %vm93_vm15, %v92_v30  }
  0x98   :  { %v98_v31 = vld [vmem:[#allocation0] sm:$0x1] }
  0x99   :  { %100 = vst [vmem:[%s208_s1] sm:$0x1] %v98_v31 }

// kernel: tile.43
= control target key start
LH: loop header
LB: loop body
LE: loop exit
PB: predicated region body
PF: predicated region fallthrough
CT: control target
= control target key end

     0   :  { %s28_s0 = inlined_call_operand.vmem [shape: f32[8], index: 0, kind: input, shape index: {}]   ;;  %s29_s1 = inlined_call_operand.vmem [shape: f32[16,8], index: 1, kind: output, shape index: {}]  }
   0x1   :  { %v4_v0 = vld [vmem:[%s28_s0] ss:$0 sm:$0xff] }
   0x2   :  { %5 = vst [vmem:[%s29_s1] sm:$0xff] %v4_v0  ;;  %8 = vst [vmem:[%s29_s1 + $0x8] sm:$0xff] %v4_v0 }

// kernel: tile.44
= control target key start
LH: loop header
LB: loop body
LE: loop exit
PB: predicated region body
PF: predicated region fallthrough
CT: control target
= control target key end

     0   :  { %s131_s10 = smov 120   ;;  %s132_s11 = smov 104   ;;  %vm3_vm0 = vcmask 64512   ;;  %vm9_vm1 = vcmask 1048512   ;;  %vm15_vm2 = vcmask 982912   ;;  %vm21_vm3 = vcmask 917312   ;;  %s207_s0 = inlined_call_operand.vmem [shape: f32[16,8], index: 0, kind: input, shape index: {}]   ;;  %s208_s1 = inlined_call_operand.vmem [shape: f32[1,128], index: 1, kind: output, shape index: {}]  }
   0x1   :  { %v101_v0 = vld [vmem:[%s207_s0 + $0xf] sm:$0x1]   ;;  %v103_v1 = vld [vmem:[%s207_s0 + $0xd] sm:$0x1]   ;;  %v102_v2 = vld [vmem:[%s207_s0 + $0xe] sm:$0x1]  }
   0x2   :  { %7 = vrot.lane.b32.xlu0 %v101_v0, %s131_s10  ;;  %19 = vrot.lane.b32.xlu1 %v103_v1, %s132_s11  ;;  %v104_v3 = vld [vmem:[%s207_s0 + $0xc] sm:$0x1]   ;;  %s133_s16 = smov 112   ;;  %s134_s17 = smov 96   ;;  %v105_v4 = vld [vmem:[%s207_s0 + $0xb] sm:$0x1]  }
   0x3   :  { %v106_v5 = vld [vmem:[%s207_s0 + $0xa] sm:$0x1]   ;;  %v2_v6 = vld [vmem:[%s207_s0] sm:$0x1]   ;;  %s135_s24 = smov 88   ;;  %s136_s25 = smov 80  }
   0x4   :  { %4 = vst.msk [vmem:[#allocation0] sm:$0x1] %vm3_vm0, %v2_v6   ;;  %v107_v7 = vld [vmem:[%s207_s0 + $0x9] sm:$0x1]   ;;  %v108_v8 = vld [vmem:[%s207_s0 + $0x8] sm:$0x1]  }
   0x5   :  { %s137_s30 = smov 72   ;;  %s138_s2 = smov 64   ;;  %v109_v9 = vld [vmem:[%s207_s0 + $0x7] sm:$0x1]   ;;  %v110_v10 = vld [vmem:[%s207_s0 + $0x6] sm:$0x1]  }
   0x6   :  { %13 = vrot.lane.b32.xlu0 %v102_v2, %s133_s16  ;;  %25 = vrot.lane.b32.xlu1 %v104_v3, %s134_s17  ;;  %s139_s7 = smov 56   ;;  %s140_s8 = smov 48   ;;  %v111_v11 = vld [vmem:[%s207_s0 + $0x5] sm:$0x1]   ;;  %v112_v12 = vld [vmem:[%s207_s0 + $0x4] sm:$0x1]  }
   0x7   :  { %s141_s13 = smov 40   ;;  %s142_s14 = smov 32   ;;  %v113_v13 = vld [vmem:[%s207_s0 + $0x3] sm:$0x1]   ;;  %v114_v14 = vld [vmem:[%s207_s0 + $0x2] sm:$0x1]  }
   0x8   :  { %s143_s19 = smov 24   ;;  %s144_s20 = smov 16   ;;  %v115_v15 = vld [vmem:[%s207_s0 + $0x1] sm:$0x1]   ;;  %vm27_vm4 = vcmask 851712   ;;  %vm33_vm5 = vcmask 786112  }
   0x9   :  { %s145_s0 = smov 8   ;;  %vm39_vm6 = vcmask 720512   ;;  %vm45_vm7 = vcmask 654912   ;;  %vm51_vm8 = vcmask 589312   ;;  %vm57_vm9 = vcmask 523712  }
   0xa   :  { %31 = vrot.lane.b32.xlu0 %v105_v4, %s135_s24  ;;  %37 = vrot.lane.b32.xlu1 %v106_v5, %s136_s25  ;;  %vm63_vm10 = vcmask 458112   ;;  %vm69_vm11 = vcmask 392512   ;;  %vm75_vm12 = vcmask 326912   ;;  %vm81_vm13 = vcmask 261312  }
   0xb   :  { %vm87_vm14 = vcmask 195712   ;;  %vm93_vm15 = vcmask 130112  }
   0xe   :  { %43 = vrot.lane.b32.xlu0 %v107_v7, %s137_s30  ;;  %49 = vrot.lane.b32.xlu1 %v108_v8, %s138_s2 }
  0x12   :  { %55 = vrot.lane.b32.xlu0 %v109_v9, %s139_s7  ;;  %61 = vrot.lane.b32.xlu1 %v110_v10, %s140_s8 }
  0x16   :  { %67 = vrot.lane.b32.xlu0 %v111_v11, %s141_s13  ;;  %73 = vrot.lane.b32.xlu1 %v112_v12, %s142_s14 }
  0x1a   :  { %79 = vrot.lane.b32.xlu0 %v113_v13, %s143_s19  ;;  %85 = vrot.lane.b32.xlu1 %v114_v14, %s144_s20 }
  0x1e   :  { %91 = vrot.lane.b32.xlu0 %v115_v15, %s145_s0 }
  0x74   :  { %v8_v16 = vpop.permute.xlu0 %7   ;;  %v20_v17 = vpop.permute.xlu1 %19  }
  0x75   :  { %10 = vst.msk [vmem:[#allocation0] sm:$0x1] %vm9_vm1, %v8_v16  }
  0x78   :  { %v14_v18 = vpop.permute.xlu0 %13   ;;  %v26_v19 = vpop.permute.xlu1 %25  }
  0x79   :  { %16 = vst.msk [vmem:[#allocation0] sm:$0x1] %vm15_vm2, %v14_v18  }
  0x7a   :  { %22 = vst.msk [vmem:[#allocation0] sm:$0x1] %vm21_vm3, %v20_v17  }
  0x7b   :  { %28 = vst.msk [vmem:[#allocation0] sm:$0x1] %vm27_vm4, %v26_v19  }
  0x7c   :  { %v32_v20 = vpop.permute.xlu0 %31   ;;  %v38_v21 = vpop.permute.xlu1 %37  }
  0x7d   :  { %34 = vst.msk [vmem:[#allocation0] sm:$0x1] %vm33_vm5, %v32_v20  }
  0x7e   :  { %40 = vst.msk [vmem:[#allocation0] sm:$0x1] %vm39_vm6, %v38_v21  }
  0x80   :  { %v44_v22 = vpop.permute.xlu0 %43   ;;  %v50_v23 = vpop.permute.xlu1 %49  }
  0x81   :  { %46 = vst.msk [vmem:[#allocation0] sm:$0x1] %vm45_vm7, %v44_v22  }
  0x82   :  { %52 = vst.msk [vmem:[#allocation0] sm:$0x1] %vm51_vm8, %v50_v23  }
  0x84   :  { %v56_v24 = vpop.permute.xlu0 %55   ;;  %v62_v25 = vpop.permute.xlu1 %61  }
  0x85   :  { %58 = vst.msk [vmem:[#allocation0] sm:$0x1] %vm57_vm9, %v56_v24  }
  0x86   :  { %64 = vst.msk [vmem:[#allocation0] sm:$0x1] %vm63_vm10, %v62_v25  }
  0x88   :  { %v68_v26 = vpop.permute.xlu0 %67   ;;  %v74_v27 = vpop.permute.xlu1 %73  }
  0x89   :  { %70 = vst.msk [vmem:[#allocation0] sm:$0x1] %vm69_vm11, %v68_v26  }
  0x8a   :  { %76 = vst.msk [vmem:[#allocation0] sm:$0x1] %vm75_vm12, %v74_v27  }
  0x8c   :  { %v80_v28 = vpop.permute.xlu0 %79   ;;  %v86_v29 = vpop.permute.xlu1 %85  }
  0x8d   :  { %82 = vst.msk [vmem:[#allocation0] sm:$0x1] %vm81_vm13, %v80_v28  }
  0x8e   :  { %88 = vst.msk [vmem:[#allocation0] sm:$0x1] %vm87_vm14, %v86_v29  }
  0x90   :  { %v92_v30 = vpop.permute.xlu0 %91  }
  0x91   :  { %94 = vst.msk [vmem:[#allocation0] sm:$0x1] %vm93_vm15, %v92_v30  }
  0x98   :  { %v98_v31 = vld [vmem:[#allocation0] sm:$0x1] }
  0x99   :  { %100 = vst [vmem:[%s208_s1] sm:$0x1] %v98_v31 }

// kernel: conv_block_forward.2
= control target key start
LH: loop header
LB: loop body
LE: loop exit
PB: predicated region body
PF: predicated region fallthrough
CT: control target
= control target key end

     0   :  { %vm60_vm4 = vsmask.f32 256  ;;  %vm78_vm5 = vcmask 1040384   ;;  %vm119_vm7 = vcmask 523264   ;;  %vm365_vm8 = vcmask 1046528   ;;  %s755_s3 = inlined_call_operand.vmem [shape: bf16[3,64,128], index: 3, kind: input, shape index: {}]   ;;  %s756_s0 = inlined_call_operand.vmem [shape: f32[32,64], index: 0, kind: input, shape index: {}]   ;;  %s757_s1 = inlined_call_operand.vmem [shape: f32[1,64], index: 1, kind: input, shape index: {}]   ;;  %s758_s2 = inlined_call_operand.vmem [shape: f32[1,64], index: 2, kind: input, shape index: {}]   ;;  %s759_s4 = inlined_call_operand.vmem [shape: bf16[32,128], index: 4, kind: output, shape index: {0}]   ;;  %s760_s5 = inlined_call_operand.vmem [shape: f32[1,2,128], index: 5, kind: output, shape index: {1}]  }
   0x1   :  { %v637_v0 = vld [vmem:[%s755_s3] sm:$0xff]   ;;  %v638_v1 = vld [vmem:[%s755_s3 + $0x8] sm:$0xff]   ;;  %v640_v3 = vld [vmem:[%s755_s3 + $0x10] sm:$0xff]   ;;  %vm252_vm9 = vsmask.f32 7424 }
   0x2   :  { %600 = vmatprep.subr.bf16.mxu0 %v637_v0  ;;  %v639_v2 = vld [vmem:[%s755_s3 + $0x20] sm:$0xff]   ;;  %v641_v4 = vld [vmem:[%s755_s3 + $0x28] sm:$0xff]   ;;  %v642_v5 = vld [vmem:[%s755_s3 + $0x18] sm:$0xff]  }
   0x3   :  { %601 = vmatpush3.bf16.msra.mxu0 %v637_v0  ;;  %612 = vmatprep.subr.bf16.mxu1 %v639_v2  ;;  %v643_v6 = vld [vmem:[%s755_s3 + $0x30] sm:$0xff]   ;;  %v20_v7 = vld [vmem:[%s756_s0] sm:$0xff]  ;;  %v21_v8 = vld [vmem:[%s756_s0 + $0x8] sm:$0xff]  ;;  %v82_v0 = vlaneseq }
   0x4   :  { %602 = vmatprep.subr.bf16.mxu0 %v638_v1  ;;  %613 = vmatpush3.bf16.msra.mxu1 %v639_v2  ;;  %v22_v9 = vld [vmem:[%s756_s0 + $0x10] sm:$0xff]  ;;  %v23_v10 = vld [vmem:[%s756_s0 + $0x18] sm:$0xff]  ;;  %v523_v11 = vld [vmem:[%s757_s1] ss:$0 sm:$0xff] }
   0x5   :  { %614 = vmatprep.subr.bf16.mxu1 %v641_v4  ;;  %v524_v12 = vld [vmem:[%s758_s2] ss:$0 sm:$0xff]  ;;  %v31_v13 = vmul.f32 %v523_v11, %v20_v7  ;;  %v32_v14 = vmul.f32 %v523_v11, %v21_v8  ;;  %v33_v15 = vmul.f32 %v523_v11, %v22_v9  ;;  %v34_v16 = vmul.f32 %v523_v11, %v23_v10  ;;  %v645_v21 = vld [vmem:[%s755_s3 + $0x38] sm:$0xff]   ;;  %vm79_vm6 = vmand %vm78_vm5, %vm60_vm4 }
   0x6   :  { %v644_v22 = vld [vmem:[%s755_s3 + $0x40] sm:$0xff]   ;;  %v646_v44 = vld [vmem:[%s755_s3 + $0x48] sm:$0xff]   ;;  %v647_v55 = vld [vmem:[%s755_s3 + $0x50] sm:$0xff]   ;;  %v649_v8 = vmov 0.0  }
   0x7   :  { %603 = vmatpush3.bf16.msra.mxu0 %v638_v1  ;;  %v42_v17 = vadd.f32 %v524_v12, %v31_v13  ;;  %v43_v18 = vadd.f32 %v524_v12, %v32_v14  ;;  %v44_v19 = vadd.f32 %v524_v12, %v33_v15  ;;  %v45_v20 = vadd.f32 %v524_v12, %v34_v16  ;;  %v648_v61 = vld [vmem:[%s755_s3 + $0x58] sm:$0xff]  }
   0x8   :  { %604 = vmatprep.subr.bf16.mxu0 %v640_v3  ;;  %615 = vmatpush3.bf16.msra.mxu1 %v641_v4  ;;  %v83_v1 = vshrl.u32 %v82_v0, 7 }
   0x9   :  { %616 = vmatprep.subr.bf16.mxu1 %v643_v6  ;;  %vm46_vm0 = vcmp.ge.f32.partialorder %v42_v17, 0.0  ;;  %vm47_vm1 = vcmp.ge.f32.partialorder %v43_v18, 0.0  ;;  %vm48_vm2 = vcmp.ge.f32.partialorder %v44_v19, 0.0  ;;  %vm49_vm3 = vcmp.ge.f32.partialorder %v45_v20, 0.0 }
   0xa   :  { %v50_v23 = vmul.f32 0.01, %v42_v17  ;;  %v51_v24 = vmul.f32 0.01, %v43_v18  ;;  %v52_v25 = vmul.f32 0.01, %v44_v19 }
   0xb   :  { %605 = vmatpush3.bf16.msra.mxu0 %v640_v3  ;;  %v53_v26 = vmul.f32 0.01, %v45_v20  ;;  %v85_v2 = vadd.s32 16, %v83_v1  ;;  %v179_v4 = vand.u32 15, %v83_v1  ;;  %v86_v12 = vadd.s32 24, %v83_v1 }
   0xc   :  { %606 = vmatprep.subr.bf16.mxu0 %v642_v5  ;;  %617 = vmatpush3.bf16.msra.mxu1 %v643_v6  ;;  %v54_v27 = vsel %vm46_vm0, %v42_v17, %v50_v23  ;;  %v55_v28 = vsel %vm47_vm1, %v43_v18, %v51_v24  ;;  %v56_v29 = vsel %vm48_vm2, %v44_v19, %v52_v25  ;;  %v84_v14 = vadd.s32 8, %v83_v1 }
   0xd   :  { %618 = vmatprep.subr.bf16.mxu1 %v645_v21  ;;  %v57_v30 = vsel %vm49_vm3, %v45_v20, %v53_v26  ;;  %v58_v31 = vpack.c.bf16 %v55_v28, %v54_v27  ;;  %v193_v3 = vand.u32 15, %v85_v2  ;;  %vm223_vm11 = vcmp.ge.s32.totalorder %v179_v4, 1 }
   0xe   :  { %v59_v32 = vpack.c.bf16 %v57_v30, %v56_v29  ;;  %v531_v11 = vsel %vm223_vm11, 1.0, %v649_v8  ;;  %v186_v24 = vand.u32 15, %v84_v14 }
   0xf   :  { %607 = vmatpush3.bf16.msra.mxu0 %v642_v5  ;;  %v62_v33 = vshrl.u32 %v58_v31, 16  ;;  %v65_v34 = vshll.u32 %v58_v31, 16  ;;  %vm225_vm10 = vcmp.ge.s32.totalorder %v193_v3, 1 }
  0x10   :  { %624 = vmatprep.subr.bf16.mxu0 %v644_v22  ;;  %619 = vmatpush3.bf16.msra.mxu1 %v645_v21  ;;  %v69_v35 = vshrl.u32 %v59_v32, 16  ;;  %v72_v36 = vshll.u32 %v59_v32, 16  ;;  %v532_v9 = vsel %vm225_vm10, 1.0, %v649_v8  ;;  %v200_v21 = vand.u32 15, %v86_v12 }
  0x11   :  { %v64_v37 = vrot.slane %v62_v33, 7  ;;  %vm451_vm13 = vcmp.lt.s32.totalorder %v186_v24, 15 }
  0x12   :  { %v71_v38 = vrot.slane %v69_v35, 7  ;;  %vm453_vm12 = vcmp.lt.s32.totalorder %v200_v21, 15  ;;  %v561_v30 = vsel %vm451_vm13, 1.0, %v649_v8 }
  0x13   :  { %v67_v39 = vor.u32 %v65_v34, %v64_v37  ;;  %v562_v27 = vsel %vm453_vm12, 1.0, %v649_v8 }
  0x14   :  { %v81_v40 = vsel %vm79_vm6, %v71_v38, 0  ;;  %v74_v41 = vor.u32 %v72_v36, %v71_v38 }
  0x15   :  { %v80_v42 = vsel %vm79_vm6, 0, %v67_v39  ;;  %v267_v43 = vshll.u32 %v81_v40, 16  ;;  %v369_v62 = vrot.slane %v81_v40, 1 }
  0x16   :  { %608 = vmatprep.mubr.msk.bf16.mxu0 %vm119_vm7, %v80_v42  ;;  %v366_v45 = vrot.slane %v80_v42, 1  ;;  %v75_v46 = vsel %vm60_vm4, %v64_v37, %v74_v41  ;;  %v253_v47 = vshrl.u32 %v80_v42, 16  ;;  %v255_v48 = vshll.u32 %v80_v42, 16 }
  0x17   :  { %609 = vmatmul.mubr.msk.bf16.vlgmr.msra.gmra.mrb[0].mxu0 %vm119_vm7, %v75_v46  ;;  %v263_v49 = vshrl.u32 %v75_v46, 16  ;;  %v367_v50 = vrot.slane %v75_v46, 1  ;;  %v259_v51 = vshll.u32 %v75_v46, 16  ;;  %v269_v53 = vrot.slane %v267_v43, 1 }
  0x18   :  { %625 = vmatpush3.bf16.msra.mxu0 %v644_v22  ;;  %v257_v52 = vrot.slane %v255_v48, 1 }
  0x19   :  { %626 = vmatprep.subr.bf16.mxu0 %v646_v44  ;;  %v261_v54 = vrot.slane %v259_v51, 1  ;;  %v368_v56 = vsel %vm365_vm8, %v366_v45, %v367_v50  ;;  %v370_v63 = vsel %vm365_vm8, %v367_v50, %v369_v62 }
  0x1a   :  { %v258_v57 = vor.u32 %v257_v52, %v253_v47  ;;  %632 = vmatprep.mubr.msk.bf16.mxu0 %vm119_vm7, %v368_v56 }
  0x1b   :  { %v265_v58 = vor.u32 %v263_v49, %v261_v54 }
  0x1c   :  { %v262_v59 = vsel %vm252_vm9, %v258_v57, %v261_v54  ;;  %627 = vmatpush3.bf16.msra.mxu0 %v646_v44 }
  0x1d   :  { %620 = vmatprep.mubr.msk.bf16.mxu1 %vm119_vm7, %v262_v59  ;;  %v270_v60 = vsel %vm252_vm9, %v265_v58, %v269_v53  ;;  %628 = vmatprep.subr.bf16.mxu0 %v647_v55 }
  0x1e   :  { %621 = vmatmul.mubr.msk.bf16.vlgmr.msra.gmra.mrb[0].mxu1 %vm119_vm7, %v270_v60 }
  0x20   :  { %629 = vmatpush3.bf16.msra.mxu0 %v647_v55 }
  0x21   :  { %630 = vmatprep.subr.bf16.mxu0 %v648_v61 }
  0x24   :  { %631 = vmatpush3.bf16.msra.mxu0 %v648_v61 }
  0x27   :  { %633 = vmatmul.mubr.msk.bf16.vlgmr.msra.gmra.mrb[4].mxu0 %vm119_vm7, %v370_v63 }
  0xea   :  { %v610_v5 = vpop.f32.mrb[0].mxu0 }
  0xeb   :  { %v160_v6 = vpop.f32.mrb[1].mxu0  ;;  %v237_v13 = vmul.f32 %v610_v5, %v532_v9 }
  0xec   :  { %v611_v7 = vpop.f32.mrb[2].mxu0  ;;  %v235_v15 = vmul.f32 %v531_v11, %v160_v6 }
  0xed   :  { %v163_v10 = vpop.f32.mrb[3].mxu0 }
  0xf1   :  { %v622_v16 = vpop.f32.mrb[0].mxu1 }
  0xf2   :  { %v352_v17 = vadd.f32 %v622_v16, %v237_v13  ;;  %v335_v18 = vpop.f32.mrb[1].mxu1 }
  0xf3   :  { %v350_v19 = vadd.f32 %v335_v18, %v235_v15  ;;  %v623_v20 = vpop.f32.mrb[2].mxu1 }
  0xf4   :  { %v353_v22 = vadd.f32 %v623_v20, %v611_v7  ;;  %v338_v23 = vpop.f32.mrb[3].mxu1 }
  0xf5   :  { %v351_v25 = vadd.f32 %v338_v23, %v163_v10 }
  0xfa   :  { %v634_v26 = vpop.f32.mrb[4].mxu0 }
  0xfb   :  { %v468_v28 = vadd.f32 %v634_v26, %v352_v17  ;;  %v435_v29 = vpop.f32.mrb[5].mxu0 }
  0xfc   :  { %v466_v31 = vadd.f32 %v435_v29, %v350_v19  ;;  %v635_v32 = vpop.f32.mrb[6].mxu0 }
  0xfd   :  { %v465_v33 = vmul.f32 %v635_v32, %v562_v27  ;;  %v438_v34 = vpop.f32.mrb[7].mxu0  ;;  %v501_v43 = vmul.f32 %v468_v28, %v468_v28 }
  0xfe   :  { %v463_v35 = vmul.f32 %v561_v30, %v438_v34  ;;  %v499_v39 = vmul.f32 %v466_v31, %v466_v31 }
  0xff   :  { %v469_v36 = vadd.f32 %v465_v33, %v353_v22 }
 0x100   :  { %v467_v37 = vadd.f32 %v463_v35, %v351_v25 }
 0x101   :  { %v579_v38 = vpack.c.bf16 %v469_v36, %v468_v28  ;;  %v502_v46 = vmul.f32 %v469_v36, %v469_v36 }
 0x102   :  { %v574_v40 = vpack.c.bf16 %v467_v37, %v466_v31  ;;  %v490_v41 = vadd.f32 %v467_v37, %v466_v31  ;;  %v500_v42 = vmul.f32 %v467_v37, %v467_v37 }
 0x103   :  { %581 = vst [vmem:[%s759_s4 + $0x8] sm:$0xff] %v579_v38  }
 0x104   :  { %575 = vst [vmem:[%s759_s4] sm:$0xff] %v574_v40   ;;  %v491_v44 = vadd.f32 %v490_v41, %v468_v28  ;;  %v503_v45 = vadd.f32 %v500_v42, %v499_v39 }
 0x106   :  { %v492_v47 = vadd.f32 %v491_v44, %v469_v36  ;;  %v504_v48 = vadd.f32 %v503_v45, %v501_v43 }
 0x108   :  { %v493_v49 = vrot.slane %v492_v47, 4  ;;  %v505_v50 = vadd.f32 %v504_v48, %v502_v46 }
 0x10a   :  { %v494_v51 = vadd.f32 %v493_v49, %v492_v47  ;;  %v506_v52 = vrot.slane %v505_v50, 4 }
 0x10c   :  { %v495_v53 = vrot.slane %v494_v51, 2  ;;  %v507_v54 = vadd.f32 %v506_v52, %v505_v50 }
 0x10e   :  { %v496_v55 = vadd.f32 %v495_v53, %v494_v51  ;;  %v508_v56 = vrot.slane %v507_v54, 2 }
 0x110   :  { %v497_v57 = vrot.slane %v496_v55, 1  ;;  %v509_v58 = vadd.f32 %v508_v56, %v507_v54 }
 0x112   :  { %v510_v59 = vrot.slane %v509_v58, 1  ;;  %v498_v60 = vadd.f32 %v497_v57, %v496_v55 }
 0x114   :  { %v511_v61 = vadd.f32 %v510_v59, %v509_v58 }
 0x116   :  { %v513_v62 = vsel %vm78_vm5, %v498_v60, %v511_v61 }
 0x117   :  { %514 = vst [vmem:[%s760_s5] sm:$0x3] %v513_v62 }

// kernel: conv_block_forward.3
= control target key start
LH: loop header
LB: loop body
LE: loop exit
PB: predicated region body
PF: predicated region fallthrough
CT: control target
= control target key end

     0   :  { %vm139_vm0 = vcmask 523264   ;;  %vm71_vm1 = vsmask.f32 256  ;;  %vm90_vm6 = vcmask 1040384   ;;  %vm541_vm8 = vcmask 1046528   ;;  %s1061_s5 = inlined_call_operand.vmem [shape: bf16[64,128], index: 5, kind: input, shape index: {}]   ;;  %s1062_s4 = inlined_call_operand.vmem [shape: bf16[3,128,128], index: 4, kind: input, shape index: {}]   ;;  %s1063_s1 = inlined_call_operand.vmem [shape: f32[32,64], index: 1, kind: input, shape index: {}]   ;;  %s1064_s0 = inlined_call_operand.vmem [shape: bf16[32,128], index: 0, kind: input, shape index: {}]   ;;  %s1065_s2 = inlined_call_operand.vmem [shape: f32[1,128], index: 2, kind: input, shape index: {}]   ;;  %s1066_s3 = inlined_call_operand.vmem [shape: f32[1,128], index: 3, kind: input, shape index: {}]   ;;  %s1067_s6 = inlined_call_operand.vmem [shape: f32[1,128], index: 6, kind: input, shape index: {}]   ;;  %s1068_s7 = inlined_call_operand.vmem [shape: f32[32,128], index: 7, kind: output, shape index: {}]  }
   0x1   :  { %v861_v0 = vld [vmem:[%s1061_s5] sm:$0xff]   ;;  %v863_v2 = vld [vmem:[%s1061_s5 + $0x8] sm:$0xff]   ;;  %v865_v4 = vld [vmem:[%s1061_s5 + $0x10] sm:$0xff]   ;;  %vm398_vm9 = vsmask.f32 7424 }
   0x2   :  { %v862_v1 = vld [vmem:[%s1062_s4] sm:$0xff]   ;;  %788 = vmatprep.subr.bf16.mxu0 %v861_v0  ;;  %v864_v3 = vld [vmem:[%s1062_s4 + $0x8] sm:$0xff]   ;;  %v866_v5 = vld [vmem:[%s1062_s4 + $0x10] sm:$0xff]  }
   0x3   :  { %800 = vmatprep.subr.bf16.mxu1 %v862_v1  ;;  %789 = vmatpush3.bf16.msra.mxu0 %v861_v0  ;;  %v867_v6 = vld [vmem:[%s1061_s5 + $0x18] sm:$0xff]   ;;  %v94_v7 = vld [vmem:[%s1063_s1] sm:$0xff]  ;;  %v95_v8 = vld [vmem:[%s1063_s1 + $0x8] sm:$0xff] }
   0x4   :  { %801 = vmatpush3.bf16.msra.mxu1 %v862_v1  ;;  %790 = vmatprep.subr.bf16.mxu0 %v863_v2  ;;  %v868_v9 = vld [vmem:[%s1062_s4 + $0x18] sm:$0xff]   ;;  %v98_v10 = vpack.c.bf16 %v95_v8, %v94_v7  ;;  %v96_v11 = vld [vmem:[%s1063_s1 + $0x10] sm:$0xff]  ;;  %v870_v13 = vld [vmem:[%s1062_s4 + $0x40] sm:$0xff]  }
   0x5   :  { %802 = vmatprep.subr.bf16.mxu1 %v864_v3  ;;  %v97_v12 = vld [vmem:[%s1063_s1 + $0x18] sm:$0xff]  ;;  %v869_v14 = vld [vmem:[%s1062_s4 + $0x20] sm:$0xff]   ;;  %v872_v16 = vld [vmem:[%s1062_s4 + $0x48] sm:$0xff]  }
   0x6   :  { %796 = vmatprep.mubr.msk.bf16.mxu0 %vm139_vm0, %v98_v10  ;;  %v99_v15 = vpack.c.bf16 %v97_v12, %v96_v11  ;;  %v871_v17 = vld [vmem:[%s1062_s4 + $0x28] sm:$0xff]   ;;  %v744_v18 = vld [vmem:[%s1064_s0] sm:$0xff]   ;;  %v874_v26 = vld [vmem:[%s1062_s4 + $0x50] sm:$0xff]  }
   0x7   :  { %791 = vmatpush3.bf16.msra.mxu0 %v863_v2  ;;  %v751_v19 = vld [vmem:[%s1064_s0 + $0x8] sm:$0xff]   ;;  %v745_v20 = vunpack.c.l.bf16 %v744_v18  ;;  %v746_v21 = vunpack.c.h.bf16 %v744_v18  ;;  %v674_v24 = vld [vmem:[%s1065_s2] ss:$0 sm:$0xff]  ;;  %v873_v30 = vld [vmem:[%s1062_s4 + $0x30] sm:$0xff]  }
   0x8   :  { %803 = vmatpush3.bf16.msra.mxu1 %v864_v3  ;;  %792 = vmatprep.subr.bf16.mxu0 %v865_v4  ;;  %v749_v22 = vunpack.c.l.bf16 %v751_v19  ;;  %v750_v23 = vunpack.c.h.bf16 %v751_v19  ;;  %v675_v25 = vld [vmem:[%s1066_s3] ss:$0 sm:$0xff]  ;;  %v876_v36 = vld [vmem:[%s1062_s4 + $0x58] sm:$0xff]   ;;  %v879_v55 = vld [vmem:[%s1062_s4 + $0x68] sm:$0xff]  }
   0x9   :  { %804 = vmatprep.subr.bf16.mxu1 %v866_v5  ;;  %v42_v27 = vmul.f32 %v745_v20, %v674_v24  ;;  %v43_v28 = vmul.f32 %v746_v21, %v674_v24  ;;  %v875_v38 = vld [vmem:[%s1062_s4 + $0x38] sm:$0xff]   ;;  %v877_v47 = vld [vmem:[%s1062_s4 + $0x60] sm:$0xff]   ;;  %vm91_vm7 = vmand %vm90_vm6, %vm71_vm1 }
   0xa   :  { %v44_v29 = vmul.f32 %v749_v22, %v674_v24  ;;  %v45_v31 = vmul.f32 %v750_v23, %v674_v24  ;;  %v878_v49 = vld [vmem:[%s1062_s4 + $0x80] sm:$0xff]   ;;  %v880_v61 = vld [vmem:[%s1062_s4 + $0x88] sm:$0xff]   ;;  %v881_v62 = vld [vmem:[%s1062_s4 + $0x70] sm:$0xff]   ;;  %v195_v24 = vlaneseq }
   0xb   :  { %793 = vmatpush3.bf16.msra.mxu0 %v865_v4  ;;  %v53_v32 = vadd.f32 %v675_v25, %v42_v27  ;;  %v54_v33 = vadd.f32 %v675_v25, %v43_v28  ;;  %v882_v8 = vld [vmem:[%s1062_s4 + $0x90] sm:$0xff]   ;;  %v885_v18 = vld [vmem:[%s1062_s4 + $0xa0] sm:$0xff]   ;;  %v886_v19 = vld [vmem:[%s1062_s4 + $0xa8] sm:$0xff]  }
   0xc   :  { %805 = vmatpush3.bf16.msra.mxu1 %v866_v5  ;;  %794 = vmatprep.subr.bf16.mxu0 %v867_v6  ;;  %v55_v34 = vadd.f32 %v675_v25, %v44_v29  ;;  %v56_v35 = vadd.f32 %v675_v25, %v45_v31  ;;  %v887_v20 = vld [vmem:[%s1062_s4 + $0xb0] sm:$0xff]   ;;  %v888_v21 = vld [vmem:[%s1062_s4 + $0xb8] sm:$0xff]   ;;  %v196_v28 = vshrl.u32 %v195_v24, 7 }
   0xd   :  { %806 = vmatprep.subr.bf16.mxu1 %v868_v9  ;;  %vm57_vm2 = vcmp.ge.f32.partialorder %v53_v32, 0.0  ;;  %vm58_vm3 = vcmp.ge.f32.partialorder %v54_v33, 0.0  ;;  %v61_v37 = vmul.f32 0.01, %v53_v32  ;;  %v62_v39 = vmul.f32 0.01, %v54_v33 }
   0xe   :  { %vm59_vm4 = vcmp.ge.f32.partialorder %v55_v34, 0.0  ;;  %vm60_vm5 = vcmp.ge.f32.partialorder %v56_v35, 0.0  ;;  %v63_v40 = vmul.f32 0.01, %v55_v34  ;;  %v64_v41 = vmul.f32 0.01, %v56_v35 }
   0xf   :  { %795 = vmatpush3.bf16.msra.mxu0 %v867_v6  ;;  %v65_v42 = vsel %vm57_vm2, %v53_v32, %v61_v37  ;;  %v66_v43 = vsel %vm58_vm3, %v54_v33, %v62_v39  ;;  %v317_v32 = vand.u32 15, %v196_v28  ;;  %v676_v33 = vld [vmem:[%s1067_s6] ss:$0 sm:$0xff] }
  0x10   :  { %807 = vmatpush3.bf16.msra.mxu1 %v868_v9  ;;  %820 = vmatprep.subr.bf16.mxu0 %v870_v13  ;;  %v67_v44 = vsel %vm59_vm4, %v55_v34, %v63_v40  ;;  %v68_v45 = vsel %vm60_vm5, %v56_v35, %v64_v41  ;;  %v69_v46 = vpack.c.bf16 %v66_v43, %v65_v42  ;;  %v883_v9 = vld [vmem:[%s1062_s4 + $0x78] sm:$0xff]   ;;  %v889_v34 = vmov 0.0  }
  0x11   :  { %808 = vmatprep.subr.bf16.mxu1 %v869_v14  ;;  %v70_v48 = vpack.c.bf16 %v68_v45, %v67_v44  ;;  %vm361_vm11 = vcmp.ge.s32.totalorder %v317_v32, 1 }
  0x12   :  { %797 = vmatmul.mubr.msk.bf16.vlgmr.msra.gmra.mrb[0].mxu0 %vm139_vm0, %v99_v15  ;;  %v73_v50 = vshrl.u32 %v69_v46, 16  ;;  %v76_v51 = vshll.u32 %v69_v46, 16 }
  0x13   :  { %821 = vmatpush3.bf16.msra.mxu0 %v870_v13  ;;  %v80_v52 = vshrl.u32 %v70_v48, 16  ;;  %v83_v53 = vshll.u32 %v70_v48, 16 }
  0x14   :  { %809 = vmatpush3.bf16.msra.mxu1 %v869_v14  ;;  %822 = vmatprep.subr.bf16.mxu0 %v872_v16  ;;  %v75_v54 = vrot.slane %v73_v50, 7 }
  0x15   :  { %810 = vmatprep.subr.bf16.mxu1 %v871_v17  ;;  %v82_v56 = vrot.slane %v80_v52, 7 }
  0x16   :  { %v78_v57 = vor.u32 %v76_v51, %v75_v54 }
  0x17   :  { %823 = vmatpush3.bf16.msra.mxu0 %v872_v16  ;;  %v85_v58 = vor.u32 %v83_v53, %v82_v56  ;;  %v93_v60 = vsel %vm91_vm7, %v82_v56, 0  ;;  %v884_v16 = vld [vmem:[%s1062_s4 + $0x98] sm:$0xff]  }
  0x18   :  { %811 = vmatpush3.bf16.msra.mxu1 %v871_v17  ;;  %824 = vmatprep.subr.bf16.mxu0 %v874_v26  ;;  %v92_v59 = vsel %vm91_vm7, 0, %v78_v57  ;;  %v415_v6 = vshll.u32 %v93_v60, 16  ;;  %v545_v22 = vrot.slane %v93_v60, 1  ;;  %v197_v60 = vadd.s32 8, %v196_v28 }
  0x19   :  { %812 = vmatprep.subr.bf16.mxu1 %v873_v30  ;;  %816 = vmatprep.mubr.bf16.mxu1 %v92_v59  ;;  %v400_v63 = vshrl.u32 %v92_v59, 16  ;;  %v402_v0 = vshll.u32 %v92_v59, 16  ;;  %v86_v1 = vsel %vm71_vm1, %v75_v54, %v85_v58  ;;  %v542_v2 = vrot.slane %v92_v59, 1 }
  0x1a   :  { %v407_v3 = vshll.u32 %v86_v1, 16  ;;  %v543_v4 = vrot.slane %v86_v1, 1  ;;  %v411_v7 = vshrl.u32 %v86_v1, 16  ;;  %v417_v13 = vrot.slane %v415_v6, 1 }
  0x1b   :  { %825 = vmatpush3.bf16.msra.mxu0 %v874_v26  ;;  %v404_v5 = vrot.slane %v402_v0, 1  ;;  %v199_v59 = vadd.s32 24, %v196_v28 }
  0x1c   :  { %813 = vmatpush3.bf16.msra.mxu1 %v873_v30  ;;  %826 = vmatprep.subr.bf16.mxu0 %v876_v36  ;;  %v409_v10 = vrot.slane %v407_v3, 1  ;;  %v544_v11 = vsel %vm541_vm8, %v542_v2, %v543_v4  ;;  %v546_v23 = vsel %vm541_vm8, %v543_v4, %v545_v22  ;;  %v198_v30 = vadd.s32 16, %v196_v28 }
  0x1d   :  { %814 = vmatprep.subr.bf16.mxu1 %v875_v38  ;;  %v405_v12 = vor.u32 %v404_v5, %v400_v63 }
  0x1e   :  { %v413_v15 = vor.u32 %v411_v7, %v409_v10  ;;  %v331_v31 = vand.u32 15, %v198_v30 }
  0x1f   :  { %827 = vmatpush3.bf16.msra.mxu0 %v876_v36  ;;  %v410_v14 = vsel %vm398_vm9, %v405_v12, %v409_v10 }
  0x20   :  { %815 = vmatpush3.bf16.msra.mxu1 %v875_v38  ;;  %828 = vmatprep.subr.bf16.mxu0 %v877_v47  ;;  %v418_v17 = vsel %vm398_vm9, %v413_v15, %v417_v13  ;;  %vm363_vm10 = vcmp.ge.s32.totalorder %v331_v31, 1  ;;  %v691_v38 = vsel %vm361_vm11, 1.0, %v889_v34 }
  0x21   :  { %840 = vmatprep.subr.bf16.mxu1 %v878_v49  ;;  %836 = vmatprep.mubr.bf16.mxu0 %v410_v14  ;;  %v692_v35 = vsel %vm363_vm10, 1.0, %v889_v34 }
  0x23   :  { %829 = vmatpush3.bf16.msra.mxu0 %v877_v47  ;;  %817 = vmatmul.mubr.bf16.vlgmr.msra.gmra.mrb[0].mxu1 %v86_v1 }
  0x24   :  { %830 = vmatprep.subr.bf16.mxu0 %v879_v55  ;;  %841 = vmatpush3.bf16.msra.mxu1 %v878_v49 }
  0x25   :  { %842 = vmatprep.subr.bf16.mxu1 %v880_v61  ;;  %856 = vmatprep.mubr.bf16.mxu1 %v544_v11 }
  0x27   :  { %831 = vmatpush3.bf16.msra.mxu0 %v879_v55 }
  0x28   :  { %832 = vmatprep.subr.bf16.mxu0 %v881_v62  ;;  %843 = vmatpush3.bf16.msra.mxu1 %v880_v61  ;;  %v338_v61 = vand.u32 15, %v199_v59 }
  0x29   :  { %844 = vmatprep.subr.bf16.mxu1 %v882_v8 }
  0x2a   :  { %vm649_vm12 = vcmp.lt.s32.totalorder %v338_v61, 15 }
  0x2b   :  { %833 = vmatpush3.bf16.msra.mxu0 %v881_v62  ;;  %v324_v62 = vand.u32 15, %v197_v60  ;;  %v742_v0 = vsel %vm649_vm12, 1.0, %v889_v34 }
  0x2c   :  { %834 = vmatprep.subr.bf16.mxu0 %v883_v9  ;;  %845 = vmatpush3.bf16.msra.mxu1 %v882_v8 }
  0x2d   :  { %846 = vmatprep.subr.bf16.mxu1 %v884_v16  ;;  %vm647_vm13 = vcmp.lt.s32.totalorder %v324_v62, 15 }
  0x2e   :  { %v741_v3 = vsel %vm647_vm13, 1.0, %v889_v34 }
  0x2f   :  { %835 = vmatpush3.bf16.msra.mxu0 %v883_v9 }
  0x30   :  { %847 = vmatpush3.bf16.msra.mxu1 %v884_v16 }
  0x31   :  { %848 = vmatprep.subr.bf16.mxu1 %v885_v18 }
  0x32   :  { %837 = vmatmul.mubr.bf16.vlgmr.msra.gmra.mrb[4].mxu0 %v418_v17 }
  0x34   :  { %849 = vmatpush3.bf16.msra.mxu1 %v885_v18 }
  0x35   :  { %850 = vmatprep.subr.bf16.mxu1 %v886_v19 }
  0x38   :  { %851 = vmatpush3.bf16.msra.mxu1 %v886_v19 }
  0x39   :  { %852 = vmatprep.subr.bf16.mxu1 %v887_v20 }
  0x3c   :  { %853 = vmatpush3.bf16.msra.mxu1 %v887_v20 }
  0x3d   :  { %854 = vmatprep.subr.bf16.mxu1 %v888_v21 }
  0x40   :  { %855 = vmatpush3.bf16.msra.mxu1 %v888_v21 }
  0x43   :  { %857 = vmatmul.mubr.bf16.vlgmr.msra.gmra.mrb[4].mxu1 %v546_v23 }
  0xe5   :  { %v798_v25 = vpop.f32.mrb[0].mxu0 }
  0xe6   :  { %v180_v26 = vpop.f32.mrb[1].mxu0  ;;  %v189_v36 = vadd.f32 %v798_v25, %v676_v33 }
  0xe7   :  { %v799_v27 = vpop.f32.mrb[2].mxu0  ;;  %v181_v39 = vadd.f32 %v676_v33, %v180_v26 }
  0xe8   :  { %v183_v29 = vpop.f32.mrb[3].mxu0  ;;  %v192_v37 = vadd.f32 %v799_v27, %v676_v33 }
  0xe9   :  { %v184_v41 = vadd.f32 %v676_v33, %v183_v29 }
  0xf6   :  { %v818_v40 = vpop.f32.mrb[0].mxu1 }
  0xf7   :  { %v375_v42 = vmul.f32 %v818_v40, %v692_v35  ;;  %v298_v43 = vpop.f32.mrb[1].mxu1 }
  0xf8   :  { %v373_v44 = vmul.f32 %v691_v38, %v298_v43  ;;  %v819_v45 = vpop.f32.mrb[2].mxu1 }
  0xf9   :  { %v380_v46 = vadd.f32 %v819_v45, %v192_v37  ;;  %v301_v47 = vpop.f32.mrb[3].mxu1  ;;  %v379_v48 = vadd.f32 %v375_v42, %v189_v36 }
  0xfa   :  { %v378_v49 = vadd.f32 %v301_v47, %v184_v41  ;;  %v377_v50 = vadd.f32 %v373_v44, %v181_v39 }
 0x105   :  { %v838_v51 = vpop.f32.mrb[4].mxu0 }
 0x106   :  { %v520_v52 = vadd.f32 %v838_v51, %v379_v48  ;;  %v503_v53 = vpop.f32.mrb[5].mxu0 }
 0x107   :  { %v518_v54 = vadd.f32 %v503_v53, %v377_v50  ;;  %v839_v55 = vpop.f32.mrb[6].mxu0 }
 0x108   :  { %v521_v56 = vadd.f32 %v839_v55, %v380_v46  ;;  %v506_v57 = vpop.f32.mrb[7].mxu0 }
 0x109   :  { %v519_v58 = vadd.f32 %v506_v57, %v378_v49 }
 0x116   :  { %v858_v63 = vpop.f32.mrb[4].mxu1 }
 0x117   :  { %v664_v1 = vadd.f32 %v858_v63, %v520_v52  ;;  %v631_v2 = vpop.f32.mrb[5].mxu1 }
 0x118   :  { %v662_v4 = vadd.f32 %v631_v2, %v518_v54  ;;  %v859_v5 = vpop.f32.mrb[6].mxu1 }
 0x119   :  { %668 = vst [vmem:[%s1068_s7 + $0x10] sm:$0xff] %v664_v1  ;;  %v661_v6 = vmul.f32 %v859_v5, %v742_v0  ;;  %v634_v7 = vpop.f32.mrb[7].mxu1 }
 0x11a   :  { %666 = vst [vmem:[%s1068_s7] sm:$0xff] %v662_v4  ;;  %v659_v8 = vmul.f32 %v741_v3, %v634_v7 }
 0x11b   :  { %v665_v9 = vadd.f32 %v661_v6, %v521_v56 }
 0x11c   :  { %v663_v10 = vadd.f32 %v659_v8, %v519_v58 }
 0x11d   :  { %669 = vst [vmem:[%s1068_s7 + $0x18] sm:$0xff] %v665_v9 }
 0x11e   :  { %667 = vst [vmem:[%s1068_s7 + $0x8] sm:$0xff] %v663_v10 }

</bundles_post_ra>
